<compile_context>
chip_gen: v7x
topology: tpu7x:2x2x1
jax: 0.10.0
libtpu: 0.0.40
codegen_flags: <defaults>
</compile_context>

<pallas_src>
import functools

import jax
import jax.numpy as jnp
from jax.experimental import pallas as pl
from jax.experimental.pallas import tpu as pltpu

BN_EPS = 1e-5


# --------------------------------------------------------------------------
# Single fused kernel: encoder + BN + softplus + reparameterize + classifier.
# Gridless: every operand lives in VMEM for the whole (single) invocation.
# --------------------------------------------------------------------------
def fused_kernel(x_ref, w1_ref, b1_ref, w23_ref, gamma_ref, beta_ref,
                 wc_ref, bc_ref, eps_ref, out_ref, *, z_dim):
    # Cast x to bf16 only at the MXU input; keeping x f32 in HBM avoids an
    # extra wrapper pass over x while the MXU still gets bf16 operands with
    # f32 accumulation.
    x = x_ref[...].astype(jnp.bfloat16)                                # (B, 2048)

    # fc1 + relu1 (f32 elementwise).
    h = jnp.dot(x, w1_ref[...], preferred_element_type=jnp.float32) + b1_ref[...]
    h = jnp.maximum(h, 0.0)                                            # (B, h_dim) f32

    # fc2 | fc3 fused into a single MXU pass: (B, h_dim) @ (h_dim, 2*z_dim).
    ms = jnp.dot(h.astype(jnp.bfloat16), w23_ref[...],
                 preferred_element_type=jnp.float32)                   # (B, 2*z_dim) f32
    mu_pre = ms[:, :z_dim]
    s_pre = ms[:, z_dim:]

    # BatchNorm1d, training mode: batch mean + biased variance over the full
    # resident batch, folded into a single per-feature scale/shift.
    # (fc2 bias would cancel here -> dropped from the parameterization.)
    mean = jnp.mean(mu_pre, axis=0, keepdims=True)
    var = jnp.mean((mu_pre - mean) ** 2, axis=0, keepdims=True)
    scale = gamma_ref[...] * jax.lax.rsqrt(var + BN_EPS)
    shift = beta_ref[...] - mean * scale
    mu = mu_pre * scale + shift

    # softplus (f32) and reparameterize(...).rsample().
    sigma = jnp.logaddexp(s_pre, 0.0)
    z = mu + sigma * eps_ref[...]                                      # (B, z_dim) f32

    # Weight-normalized classifier.  out is (B, nclass=16): lane-sparse masked
    # store, accepted knowingly (single store of a tiny result).
    out_ref[...] = jnp.dot(z.astype(jnp.bfloat16), wc_ref[...],
                           preferred_element_type=jnp.float32) + bc_ref[...]


# --------------------------------------------------------------------------
# Wrapper: one gridless pallas_call, everything resident in VMEM.
# --------------------------------------------------------------------------
def guided_model_forward(x, eps, params):
    B, _ = x.shape
    two_z = params["w23_t"].shape[1]
    z_dim = two_z // 2
    nclass = params["wc_t"].shape[1]

    vmem = pl.BlockSpec(memory_space=pltpu.MemorySpace.VMEM)
    out = pl.pallas_call(
        functools.partial(fused_kernel, z_dim=z_dim),
        out_shape=jax.ShapeDtypeStruct((B, nclass), jnp.float32),
        in_specs=[vmem] * 9,
        out_specs=vmem,
    )(x, params["w1_t"], params["b1"], params["w23_t"],
      params["gamma"], params["beta"], params["wc_t"], params["bc"], eps)
    return out


# --------------------------------------------------------------------------
# Parameter setup (plain-JAX glue mirroring init_weights / weight_norm)
# --------------------------------------------------------------------------
def init_params(key, input_size, h_dim, z_dim, nclass):
    ks = jax.random.split(key, 5)

    def xavier_normal(k, fan_out, fan_in):
        std = (2.0 / (fan_in + fan_out)) ** 0.5
        return std * jax.random.normal(k, (fan_out, fan_in), jnp.float32)

    w1 = xavier_normal(ks[0], h_dim, input_size)      # fc1 (h_dim, 2048)
    w2 = xavier_normal(ks[1], z_dim, h_dim)           # fc2 (z_dim, h_dim)
    w3 = xavier_normal(ks[2], z_dim, h_dim)           # fc3 (z_dim, h_dim), no bias
    v = xavier_normal(ks[3], nclass, z_dim)           # classifier weight_v
    g = jnp.linalg.norm(v, axis=1)                    # weight_norm g init = ||v|| per row
    wc = (g / jnp.linalg.norm(v, axis=1))[:, None] * v  # W = g * v / ||v||_row
    gamma = 1.0 + 0.02 * jax.random.normal(ks[4], (z_dim,), jnp.float32)  # BN weight ~ N(1, .02)

    # fc2 / fc3 fused: first z_dim output lanes -> mu_pre, last z_dim -> s_pre.
    w23_t = jnp.concatenate([w2.T, w3.T], axis=1)     # (h_dim, 2*z_dim)

    return {
        # bf16 weights: one-time param-setup cast, halves the dominant HBM->VMEM DMA.
        "w1_t": w1.T.astype(jnp.bfloat16),            # (2048, h_dim)
        "b1": jnp.zeros((1, h_dim), jnp.float32),
        "w23_t": w23_t.astype(jnp.bfloat16),          # (h_dim, 2*z_dim)
        # NOTE: fc2 bias b2 intentionally omitted: training-mode BN subtracts
        # the batch mean, which cancels any per-feature constant bias exactly
        # (and init_weights zero-initializes it anyway).
        "gamma": gamma.reshape(1, z_dim),
        "beta": jnp.zeros((1, z_dim), jnp.float32),
        "wc_t": wc.T.astype(jnp.bfloat16),            # (z_dim, nclass)
        "bc": jnp.zeros((1, nclass), jnp.float32),
    }


def reference_forward(x, eps, p):
    """Pure-JAX reference mirroring the kernel's bf16-matmul / f32-accumulate path."""
    bf16 = jnp.bfloat16
    h = jnp.dot(x.astype(bf16), p["w1_t"], preferred_element_type=jnp.float32) + p["b1"]
    h = jnp.maximum(h, 0.0)
    ms = jnp.dot(h.astype(bf16), p["w23_t"], preferred_element_type=jnp.float32)
    z_dim = p["gamma"].shape[1]
    mu_pre, s_pre = ms[:, :z_dim], ms[:, z_dim:]
    mean = jnp.mean(mu_pre, axis=0, keepdims=True)
    var = jnp.mean((mu_pre - mean) ** 2, axis=0, keepdims=True)
    mu = p["gamma"] * (mu_pre - mean) * jax.lax.rsqrt(var + BN_EPS) + p["beta"]
    sigma = jax.nn.softplus(s_pre)
    z = mu + sigma * eps
    return jnp.dot(z.astype(bf16), p["wc_t"], preferred_element_type=jnp.float32) + p["bc"]


if __name__ == "__main__":
    # Small shapes consistent with the module: input fixed at 2048 by Encoder;
    # batch kept >= a handful of rows so BatchNorm batch statistics are meaningful.
    B, INPUT, H_DIM, Z_DIM, NCLASS = 64, 2048, 64, 32, 16

    key = jax.random.PRNGKey(0)
    k_x, k_eps, k_p = jax.random.split(key, 3)

    x = jax.random.normal(k_x, (B, INPUT), jnp.float32)
    eps = jax.random.normal(k_eps, (B, Z_DIM), jnp.float32)

    params = init_params(k_p, INPUT, H_DIM, Z_DIM, NCLASS)

    out = guided_model_forward(x, eps, params)
    out = jax.block_until_ready(out)

    ref = reference_forward(x, eps, params)
    assert out.shape == (B, NCLASS)
    assert jnp.allclose(out, ref, atol=2e-3, rtol=2e-3), "mismatch vs JAX reference"

    print("KERNEL_OK")
</pallas_src>

<mosaic_0001>
module attributes {stable_mosaic.version = 11 : i64} {
  func.func @fused_kernel(%arg0: memref<64x2048xf32, #tpu.memory_space<vmem>>, %arg1: memref<2048x64xbf16, #tpu.memory_space<vmem>>, %arg2: memref<1x64xf32, #tpu.memory_space<vmem>>, %arg3: memref<64x64xbf16, #tpu.memory_space<vmem>>, %arg4: memref<1x32xf32, #tpu.memory_space<vmem>>, %arg5: memref<1x32xf32, #tpu.memory_space<vmem>>, %arg6: memref<32x16xbf16, #tpu.memory_space<vmem>>, %arg7: memref<1x16xf32, #tpu.memory_space<vmem>>, %arg8: memref<64x32xf32, #tpu.memory_space<vmem>>, %arg9: memref<64x16xf32, #tpu.memory_space<vmem>>) attributes {dimension_semantics = [], scalar_prefetch = 0 : i64, scratch_operands = 0 : i64, tpu.core_type = #tpu.core_type<tc>} {
    %c0 = arith.constant 0 : index
    %c0_0 = arith.constant 0 : index
    %0 = vector.load %arg0[%c0, %c0_0] : memref<64x2048xf32, #tpu.memory_space<vmem>>, vector<64x2048xf32>
    %1 = arith.truncf %0 : vector<64x2048xf32> to vector<64x2048xbf16>
    %c0_1 = arith.constant 0 : index
    %c0_2 = arith.constant 0 : index
    %2 = vector.load %arg1[%c0_1, %c0_2] : memref<2048x64xbf16, #tpu.memory_space<vmem>>, vector<2048x64xbf16>
    %cst = arith.constant dense<0.000000e+00> : vector<64x64xf32>
    %3 = tpu.matmul %1, %2, %cst {dimension_numbers = #tpu.dot_dimension_numbers<[1], [0], [0], [1], [0, 0, 1, 1], [], []>} : vector<64x2048xbf16>, vector<2048x64xbf16>, vector<64x64xf32> -> vector<64x64xf32>
    %c0_3 = arith.constant 0 : index
    %c0_4 = arith.constant 0 : index
    %4 = vector.load %arg2[%c0_3, %c0_4] : memref<1x64xf32, #tpu.memory_space<vmem>>, vector<1x64xf32>
    %5 = vector.broadcast %4 : vector<1x64xf32> to vector<64x64xf32>
    %6 = arith.addf %3, %5 : vector<64x64xf32>
    %cst_5 = arith.constant 0.000000e+00 : f32
    %7 = vector.broadcast %cst_5 : f32 to vector<64x64xf32>
    %8 = arith.maximumf %6, %7 : vector<64x64xf32>
    %9 = arith.truncf %8 : vector<64x64xf32> to vector<64x64xbf16>
    %c0_6 = arith.constant 0 : index
    %c0_7 = arith.constant 0 : index
    %10 = vector.load %arg3[%c0_6, %c0_7] : memref<64x64xbf16, #tpu.memory_space<vmem>>, vector<64x64xbf16>
    %cst_8 = arith.constant dense<0.000000e+00> : vector<64x64xf32>
    %11 = tpu.matmul %9, %10, %cst_8 {dimension_numbers = #tpu.dot_dimension_numbers<[1], [0], [0], [1], [0, 0, 1, 1], [], []>} : vector<64x64xbf16>, vector<64x64xbf16>, vector<64x64xf32> -> vector<64x64xf32>
    %12 = vector.extract_strided_slice %11 {offsets = [0, 0], sizes = [64, 32], strides = [1, 1]} : vector<64x64xf32> to vector<64x32xf32>
    %13 = vector.extract_strided_slice %11 {offsets = [0, 32], sizes = [64, 32], strides = [1, 1]} : vector<64x64xf32> to vector<64x32xf32>
    %cst_9 = arith.constant dense<0.000000e+00> : vector<32xf32>
    %14 = vector.multi_reduction <add>, %12, %cst_9 [0] : vector<64x32xf32> to vector<32xf32>
    %15 = vector.shape_cast %14 : vector<32xf32> to vector<1x32xf32>
    %cst_10 = arith.constant 6.400000e+01 : f32
    %16 = vector.broadcast %cst_10 : f32 to vector<1x32xf32>
    %17 = arith.divf %15, %16 : vector<1x32xf32>
    %18 = vector.broadcast %17 : vector<1x32xf32> to vector<64x32xf32>
    %19 = arith.subf %12, %18 : vector<64x32xf32>
    %20 = arith.mulf %19, %19 : vector<64x32xf32>
    %cst_11 = arith.constant dense<0.000000e+00> : vector<32xf32>
    %21 = vector.multi_reduction <add>, %20, %cst_11 [0] : vector<64x32xf32> to vector<32xf32>
    %22 = vector.shape_cast %21 : vector<32xf32> to vector<1x32xf32>
    %cst_12 = arith.constant 6.400000e+01 : f32
    %23 = vector.broadcast %cst_12 : f32 to vector<1x32xf32>
    %24 = arith.divf %22, %23 : vector<1x32xf32>
    %c0_13 = arith.constant 0 : index
    %c0_14 = arith.constant 0 : index
    %25 = vector.load %arg4[%c0_13, %c0_14] : memref<1x32xf32, #tpu.memory_space<vmem>>, vector<1x32xf32>
    %cst_15 = arith.constant 9.99999974E-6 : f32
    %26 = vector.broadcast %cst_15 : f32 to vector<1x32xf32>
    %27 = arith.addf %24, %26 : vector<1x32xf32>
    %28 = math.rsqrt %27 : vector<1x32xf32>
    %29 = arith.mulf %25, %28 : vector<1x32xf32>
    %c0_16 = arith.constant 0 : index
    %c0_17 = arith.constant 0 : index
    %30 = vector.load %arg5[%c0_16, %c0_17] : memref<1x32xf32, #tpu.memory_space<vmem>>, vector<1x32xf32>
    %31 = arith.mulf %17, %29 : vector<1x32xf32>
    %32 = arith.subf %30, %31 : vector<1x32xf32>
    %33 = vector.broadcast %29 : vector<1x32xf32> to vector<64x32xf32>
    %34 = arith.mulf %12, %33 : vector<64x32xf32>
    %35 = vector.broadcast %32 : vector<1x32xf32> to vector<64x32xf32>
    %36 = arith.addf %34, %35 : vector<64x32xf32>
    %cst_18 = arith.constant 0.000000e+00 : f32
    %37 = vector.broadcast %cst_18 : f32 to vector<64x32xf32>
    %38 = arith.maximumf %13, %37 : vector<64x32xf32>
    %39 = vector.broadcast %cst_18 : f32 to vector<64x32xf32>
    %40 = arith.subf %13, %39 : vector<64x32xf32>
    %41 = arith.cmpf one, %40, %40 : vector<64x32xf32>
    %42 = vector.broadcast %cst_18 : f32 to vector<64x32xf32>
    %43 = arith.addf %13, %42 : vector<64x32xf32>
    %44 = math.absf %40 : vector<64x32xf32>
    %cst_19 = arith.constant 0.000000e+00 : f32
    %45 = vector.broadcast %cst_19 : f32 to vector<64x32xf32>
    %46 = arith.subf %45, %44 : vector<64x32xf32>
    %47 = math.exp %46 : vector<64x32xf32>
    %48 = math.log1p %47 : vector<64x32xf32>
    %49 = arith.addf %38, %48 : vector<64x32xf32>
    %50 = arith.select %41, %43, %49 : vector<64x32xi1>, vector<64x32xf32>
    %c0_20 = arith.constant 0 : index
    %c0_21 = arith.constant 0 : index
    %51 = vector.load %arg8[%c0_20, %c0_21] : memref<64x32xf32, #tpu.memory_space<vmem>>, vector<64x32xf32>
    %52 = arith.mulf %50, %51 : vector<64x32xf32>
    %53 = arith.addf %36, %52 : vector<64x32xf32>
    %54 = arith.truncf %53 : vector<64x32xf32> to vector<64x32xbf16>
    %c0_22 = arith.constant 0 : index
    %c0_23 = arith.constant 0 : index
    %55 = vector.load %arg6[%c0_22, %c0_23] : memref<32x16xbf16, #tpu.memory_space<vmem>>, vector<32x16xbf16>
    %cst_24 = arith.constant dense<0.000000e+00> : vector<64x16xf32>
    %56 = tpu.matmul %54, %55, %cst_24 {dimension_numbers = #tpu.dot_dimension_numbers<[1], [0], [0], [1], [0, 0, 1, 1], [], []>} : vector<64x32xbf16>, vector<32x16xbf16>, vector<64x16xf32> -> vector<64x16xf32>
    %c0_25 = arith.constant 0 : index
    %c0_26 = arith.constant 0 : index
    %57 = vector.load %arg7[%c0_25, %c0_26] : memref<1x16xf32, #tpu.memory_space<vmem>>, vector<1x16xf32>
    %58 = vector.broadcast %57 : vector<1x16xf32> to vector<64x16xf32>
    %59 = arith.addf %56, %58 : vector<64x16xf32>
    %c0_27 = arith.constant 0 : index
    %c0_28 = arith.constant 0 : index
    %60 = vector.load %arg9[%c0_27, %c0_28] : memref<64x16xf32, #tpu.memory_space<vmem>>, vector<64x16xf32>
    tpu.vector_store %arg9[%c0_27, %c0_28], %59 {strides = array<i32>} : memref<64x16xf32, #tpu.memory_space<vmem>>, vector<64x16xf32>,
    return
  }
}

</mosaic_0001>

<bundles_post_ra>
// kernel: tpu_custom_call.1
= control target key start
LH: loop header
LB: loop body
LE: loop exit
PB: predicated region body
PF: predicated region fallthrough
CT: control target
= control target key end

     0   :  { %s3020_s24 = smov 32   ;;  %vm1820_vm0 = vcmask 523264   ;;  %vm1898_vm1 = vcmask 261120   ;;  %s4230_s1 = inlined_call_operand.vmem [shape: bf16[2048,64], index: 1, kind: input, shape index: {}]   ;;  %s4231_s0 = inlined_call_operand.vmem [shape: f32[64,2048], index: 0, kind: input, shape index: {}]   ;;  %s4232_s2 = inlined_call_operand.vmem [shape: f32[1,64], index: 2, kind: input, shape index: {}]   ;;  %s4233_s3 = inlined_call_operand.vmem [shape: bf16[64,64], index: 3, kind: input, shape index: {}]   ;;  %s4234_s8 = inlined_call_operand.vmem [shape: f32[64,32], index: 8, kind: input, shape index: {}]   ;;  %s4235_s6 = inlined_call_operand.vmem [shape: bf16[32,16], index: 6, kind: input, shape index: {}]   ;;  %s4236_s4 = inlined_call_operand.vmem [shape: f32[1,32], index: 4, kind: input, shape index: {}]   ;;  %s4237_s5 = inlined_call_operand.vmem [shape: f32[1,32], index: 5, kind: input, shape index: {}]   ;;  %s4238_s7 = inlined_call_operand.vmem [shape: f32[1,16], index: 7, kind: input, shape index: {}]   ;;  %s4239_s9 = inlined_call_operand.vmem [shape: f32[64,16], index: 9, kind: output, shape index: {}]  }
   0x1   :  { %v2852_v0 = vld [vmem:[%s4230_s1 + $0x40] sm:$0xff]   ;;  %v2856_v4 = vld [vmem:[%s4230_s1 + $0x48] sm:$0xff]   ;;  %v2860_v8 = vld [vmem:[%s4230_s1 + $0x50] sm:$0xff]  }
   0x2   :  { %v2853_v1 = vld [vmem:[%s4230_s1 + $0xc0] sm:$0xff]   ;;  %2488 = vmatprep.subr.bf16.mxu0 %v2852_v0  ;;  %v2857_v5 = vld [vmem:[%s4230_s1 + $0xc8] sm:$0xff]   ;;  %v2861_v9 = vld [vmem:[%s4230_s1 + $0xd0] sm:$0xff]  }
   0x3   :  { %v2854_v2 = vld [vmem:[%s4230_s1] sm:$0xff]   ;;  %2528 = vmatprep.subr.bf16.mxu1 %v2853_v1  ;;  %v2858_v6 = vld [vmem:[%s4230_s1 + $0x8] sm:$0xff]   ;;  %v2862_v10 = vld [vmem:[%s4230_s1 + $0x10] sm:$0xff]  }
   0x4   :  { %v2855_v3 = vld [vmem:[%s4230_s1 + $0x80] sm:$0xff]   ;;  %2489 = vmatpush3.bf16.msra.mxu0 %v2854_v2  ;;  %v2859_v7 = vld [vmem:[%s4230_s1 + $0x88] sm:$0xff]   ;;  %v2863_v11 = vld [vmem:[%s4230_s1 + $0x90] sm:$0xff]  }
   0x5   :  { %2529 = vmatpush3.bf16.msra.mxu1 %v2855_v3  ;;  %2490 = vmatprep.subr.bf16.mxu0 %v2856_v4  ;;  %v2864_v12 = vld [vmem:[%s4230_s1 + $0x58] sm:$0xff]   ;;  %v2868_v16 = vld [vmem:[%s4230_s1 + $0x60] sm:$0xff]   ;;  %v2872_v20 = vld [vmem:[%s4230_s1 + $0x68] sm:$0xff]  }
   0x6   :  { %2530 = vmatprep.subr.bf16.mxu1 %v2857_v5  ;;  %v2865_v13 = vld [vmem:[%s4230_s1 + $0xd8] sm:$0xff]   ;;  %v2869_v17 = vld [vmem:[%s4230_s1 + $0xe0] sm:$0xff]   ;;  %v2873_v21 = vld [vmem:[%s4230_s1 + $0xe8] sm:$0xff]  }
   0x7   :  { %v2866_v14 = vld [vmem:[%s4230_s1 + $0x18] sm:$0xff]   ;;  %v2870_v18 = vld [vmem:[%s4230_s1 + $0x20] sm:$0xff]   ;;  %v2874_v22 = vld [vmem:[%s4230_s1 + $0x28] sm:$0xff]  }
   0x8   :  { %2491 = vmatpush3.bf16.msra.mxu0 %v2858_v6  ;;  %v2867_v15 = vld [vmem:[%s4230_s1 + $0x98] sm:$0xff]   ;;  %v2871_v19 = vld [vmem:[%s4230_s1 + $0xa0] sm:$0xff]   ;;  %v2875_v23 = vld [vmem:[%s4230_s1 + $0xa8] sm:$0xff]  }
   0x9   :  { %2531 = vmatpush3.bf16.msra.mxu1 %v2859_v7  ;;  %2492 = vmatprep.subr.bf16.mxu0 %v2860_v8  ;;  %v2876_v24 = vld [vmem:[%s4230_s1 + $0x70] sm:$0xff]   ;;  %v2880_v28 = vld [vmem:[%s4230_s1 + $0x78] sm:$0xff]   ;;  %v34_v32 = vld [vmem:[%s4231_s0 + $0x8] sm:$0xff] }
   0xa   :  { %2532 = vmatprep.subr.bf16.mxu1 %v2861_v9  ;;  %v2877_v25 = vld [vmem:[%s4230_s1 + $0xf0] sm:$0xff]   ;;  %v2881_v29 = vld [vmem:[%s4230_s1 + $0xf8] sm:$0xff]   ;;  %v50_v33 = vld [vmem:[%s4231_s0 + $0x88] sm:$0xff] }
   0xb   :  { %v2878_v26 = vld [vmem:[%s4230_s1 + $0x30] sm:$0xff]   ;;  %v2882_v30 = vld [vmem:[%s4230_s1 + $0x38] sm:$0xff]   ;;  %v162_v35 = vpack.c.bf16 %v50_v33, %v34_v32  ;;  %v33_v37 = vld [vmem:[%s4231_s0] sm:$0xff] }
   0xc   :  { %2493 = vmatpush3.bf16.msra.mxu0 %v2862_v10  ;;  %v2879_v27 = vld [vmem:[%s4230_s1 + $0xb0] sm:$0xff]   ;;  %v2883_v31 = vld [vmem:[%s4230_s1 + $0xb8] sm:$0xff]   ;;  %v49_v38 = vld [vmem:[%s4231_s0 + $0x80] sm:$0xff] }
   0xd   :  { %2533 = vmatpush3.bf16.msra.mxu1 %v2863_v11  ;;  %2494 = vmatprep.subr.bf16.mxu0 %v2864_v12  ;;  %v36_v34 = vld [vmem:[%s4231_s0 + $0x18] sm:$0xff]  ;;  %v161_v40 = vpack.c.bf16 %v49_v38, %v33_v37  ;;  %v35_v41 = vld [vmem:[%s4231_s0 + $0x10] sm:$0xff]  ;;  %v2884_v44 = vld [vmem:[%s4230_s1 + $0x140] sm:$0xff]  }
   0xe   :  { %2534 = vmatprep.subr.bf16.mxu1 %v2865_v13  ;;  %v52_v36 = vld [vmem:[%s4231_s0 + $0x98] sm:$0xff]  ;;  %v51_v42 = vld [vmem:[%s4231_s0 + $0x90] sm:$0xff]  ;;  %1288 = vmatprep.mubr.bf16.mxu0 %v162_v35  ;;  %v2885_v45 = vld [vmem:[%s4230_s1 + $0x1c0] sm:$0xff]  }
   0xf   :  { %v164_v39 = vpack.c.bf16 %v52_v36, %v36_v34  ;;  %v163_v43 = vpack.c.bf16 %v51_v42, %v35_v41  ;;  %v2886_v46 = vld [vmem:[%s4230_s1 + $0x100] sm:$0xff]   ;;  %v2888_v48 = vld [vmem:[%s4230_s1 + $0x148] sm:$0xff]   ;;  %v68_v54 = vld [vmem:[%s4231_s0 + $0x118] sm:$0xff] }
  0x10   :  { %2495 = vmatpush3.bf16.msra.mxu0 %v2866_v14  ;;  %v2887_v47 = vld [vmem:[%s4230_s1 + $0x180] sm:$0xff]   ;;  %v2889_v49 = vld [vmem:[%s4230_s1 + $0x1c8] sm:$0xff]   ;;  %v84_v55 = vld [vmem:[%s4231_s0 + $0x198] sm:$0xff] }
  0x11   :  { %2535 = vmatpush3.bf16.msra.mxu1 %v2867_v15  ;;  %2496 = vmatprep.subr.bf16.mxu0 %v2868_v16  ;;  %v2890_v50 = vld [vmem:[%s4230_s1 + $0x108] sm:$0xff]   ;;  %v180_v57 = vpack.c.bf16 %v84_v55, %v68_v54  ;;  %v65_v58 = vld [vmem:[%s4231_s0 + $0x100] sm:$0xff]  ;;  %v67_v60 = vld [vmem:[%s4231_s0 + $0x110] sm:$0xff] }
  0x12   :  { %2536 = vmatprep.subr.bf16.mxu1 %v2869_v17  ;;  %1353 = vmatprep.mubr.bf16.mxu1 %v164_v39  ;;  %v2891_v51 = vld [vmem:[%s4230_s1 + $0x188] sm:$0xff]   ;;  %v81_v59 = vld [vmem:[%s4231_s0 + $0x180] sm:$0xff]  ;;  %v83_v62 = vld [vmem:[%s4231_s0 + $0x190] sm:$0xff] }
  0x13   :  { %v66_v52 = vld [vmem:[%s4231_s0 + $0x108] sm:$0xff]  ;;  %v177_v61 = vpack.c.bf16 %v81_v59, %v65_v58  ;;  %v179_v63 = vpack.c.bf16 %v83_v62, %v67_v60  ;;  %v2892_v0 = vld [vmem:[%s4230_s1 + $0x150] sm:$0xff]   ;;  %v2896_v4 = vld [vmem:[%s4230_s1 + $0x158] sm:$0xff]  }
  0x14   :  { %2497 = vmatpush3.bf16.msra.mxu0 %v2870_v18  ;;  %v82_v53 = vld [vmem:[%s4231_s0 + $0x188] sm:$0xff]  ;;  %v2893_v1 = vld [vmem:[%s4230_s1 + $0x1d0] sm:$0xff]   ;;  %v2897_v5 = vld [vmem:[%s4230_s1 + $0x1d8] sm:$0xff]  }
  0x15   :  { %2537 = vmatpush3.bf16.msra.mxu1 %v2871_v19  ;;  %2498 = vmatprep.subr.bf16.mxu0 %v2872_v20  ;;  %v178_v56 = vpack.c.bf16 %v82_v53, %v66_v52  ;;  %v2894_v2 = vld [vmem:[%s4230_s1 + $0x110] sm:$0xff]   ;;  %v2898_v6 = vld [vmem:[%s4230_s1 + $0x118] sm:$0xff]   ;;  %v98_v8 = vld [vmem:[%s4231_s0 + $0x208] sm:$0xff] }
  0x16   :  { %2538 = vmatprep.subr.bf16.mxu1 %v2873_v21  ;;  %v2895_v3 = vld [vmem:[%s4230_s1 + $0x190] sm:$0xff]   ;;  %v2899_v7 = vld [vmem:[%s4230_s1 + $0x198] sm:$0xff]   ;;  %v114_v9 = vld [vmem:[%s4231_s0 + $0x288] sm:$0xff] }
  0x17   :  { %v194_v10 = vpack.c.bf16 %v114_v9, %v98_v8  ;;  %v100_v11 = vld [vmem:[%s4231_s0 + $0x218] sm:$0xff]  ;;  %v97_v13 = vld [vmem:[%s4231_s0 + $0x200] sm:$0xff]  ;;  %v99_v16 = vld [vmem:[%s4231_s0 + $0x210] sm:$0xff] }
  0x18   :  { %2499 = vmatpush3.bf16.msra.mxu0 %v2874_v22  ;;  %v116_v12 = vld [vmem:[%s4231_s0 + $0x298] sm:$0xff]  ;;  %v113_v15 = vld [vmem:[%s4231_s0 + $0x280] sm:$0xff]  ;;  %v115_v17 = vld [vmem:[%s4231_s0 + $0x290] sm:$0xff] }
  0x19   :  { %2539 = vmatpush3.bf16.msra.mxu1 %v2875_v23  ;;  %2500 = vmatprep.subr.bf16.mxu0 %v2876_v24  ;;  %v196_v14 = vpack.c.bf16 %v116_v12, %v100_v11  ;;  %v193_v18 = vpack.c.bf16 %v113_v15, %v97_v13  ;;  %v195_v19 = vpack.c.bf16 %v115_v17, %v99_v16  ;;  %v2900_v20 = vld [vmem:[%s4230_s1 + $0x160] sm:$0xff]   ;;  %v2904_v24 = vld [vmem:[%s4230_s1 + $0x168] sm:$0xff]   ;;  %v148_v32 = vld [vmem:[%s4231_s0 + $0x398] sm:$0xff] }
  0x1a   :  { %2540 = vmatprep.subr.bf16.mxu1 %v2877_v25  ;;  %v2901_v21 = vld [vmem:[%s4230_s1 + $0x1e0] sm:$0xff]   ;;  %v2905_v25 = vld [vmem:[%s4230_s1 + $0x1e8] sm:$0xff]   ;;  %v131_v37 = vld [vmem:[%s4231_s0 + $0x310] sm:$0xff] }
  0x1b   :  { %v2902_v22 = vld [vmem:[%s4230_s1 + $0x120] sm:$0xff]   ;;  %v147_v38 = vld [vmem:[%s4231_s0 + $0x390] sm:$0xff]  ;;  %v88_v8 = vld [vmem:[%s4231_s0 + $0x1b8] sm:$0xff] }
  0x1c   :  { %2501 = vmatpush3.bf16.msra.mxu0 %v2878_v26  ;;  %v2903_v23 = vld [vmem:[%s4230_s1 + $0x1a0] sm:$0xff]   ;;  %v2906_v26 = vld [vmem:[%s4230_s1 + $0x128] sm:$0xff]   ;;  %v211_v39 = vpack.c.bf16 %v147_v38, %v131_v37  ;;  %v2909_v41 = vld [vmem:[%s4230_s1 + $0x1f0] sm:$0xff]  }
  0x1d   :  { %2541 = vmatpush3.bf16.msra.mxu1 %v2879_v27  ;;  %2502 = vmatprep.subr.bf16.mxu0 %v2880_v28  ;;  %v2907_v27 = vld [vmem:[%s4230_s1 + $0x1a8] sm:$0xff]   ;;  %v129_v33 = vld [vmem:[%s4231_s0 + $0x300] sm:$0xff]  ;;  %v2910_v42 = vld [vmem:[%s4230_s1 + $0x130] sm:$0xff]  }
  0x1e   :  { %2542 = vmatprep.subr.bf16.mxu1 %v2881_v29  ;;  %v130_v28 = vld [vmem:[%s4231_s0 + $0x308] sm:$0xff]  ;;  %v145_v34 = vld [vmem:[%s4231_s0 + $0x380] sm:$0xff]  ;;  %v55_v58 = vld [vmem:[%s4231_s0 + $0xb0] sm:$0xff] }
  0x1f   :  { %v146_v29 = vld [vmem:[%s4231_s0 + $0x388] sm:$0xff]  ;;  %v209_v36 = vpack.c.bf16 %v145_v34, %v129_v33  ;;  %v37_v54 = vld [vmem:[%s4231_s0 + $0x20] sm:$0xff]  ;;  %v71_v12 = vld [vmem:[%s4231_s0 + $0x130] sm:$0xff] }
  0x20   :  { %2503 = vmatpush3.bf16.msra.mxu0 %v2882_v30  ;;  %v132_v30 = vld [vmem:[%s4231_s0 + $0x318] sm:$0xff]  ;;  %v53_v55 = vld [vmem:[%s4231_s0 + $0xa0] sm:$0xff]  ;;  %v87_v13 = vld [vmem:[%s4231_s0 + $0x1b0] sm:$0xff] }
  0x21   :  { %2543 = vmatpush3.bf16.msra.mxu1 %v2883_v31  ;;  %2568 = vmatprep.subr.bf16.mxu0 %v2884_v44  ;;  %v210_v31 = vpack.c.bf16 %v146_v29, %v130_v28  ;;  %v212_v35 = vpack.c.bf16 %v148_v32, %v132_v30  ;;  %v2912_v44 = vld [vmem:[%s4230_s1 + $0x178] sm:$0xff]   ;;  %v2916_v60 = vld [vmem:[%s4230_s1 + $0x240] sm:$0xff]   ;;  %v183_v15 = vpack.c.bf16 %v87_v13, %v71_v12  ;;  %v2924_v16 = vld [vmem:[%s4230_s1 + $0x250] sm:$0xff]  }
  0x22   :  { %2608 = vmatprep.subr.bf16.mxu1 %v2885_v45  ;;  %v2913_v45 = vld [vmem:[%s4230_s1 + $0x1f8] sm:$0xff]   ;;  %v2918_v62 = vld [vmem:[%s4230_s1 + $0x200] sm:$0xff]   ;;  %v2925_v17 = vld [vmem:[%s4230_s1 + $0x2d0] sm:$0xff]  }
  0x23   :  { %1289 = vmatmul.mubr.bf16.vlgmr.msra.gmra.mrb[0].mxu0 %v161_v40  ;;  %v2908_v40 = vld [vmem:[%s4230_s1 + $0x170] sm:$0xff]   ;;  %v69_v9 = vld [vmem:[%s4231_s0 + $0x120] sm:$0xff]  ;;  %v120_v28 = vld [vmem:[%s4231_s0 + $0x2b8] sm:$0xff] }
  0x24   :  { %1354 = vmatmul.mubr.bf16.vlgmr.msra.gmra.mrb[0].mxu1 %v163_v43  ;;  %2569 = vmatpush3.bf16.msra.mxu0 %v2886_v46  ;;  %v2911_v43 = vld [vmem:[%s4230_s1 + $0x1b0] sm:$0xff]   ;;  %v2914_v46 = vld [vmem:[%s4230_s1 + $0x138] sm:$0xff]   ;;  %v85_v11 = vld [vmem:[%s4231_s0 + $0x1a0] sm:$0xff] }
  0x25   :  { %2609 = vmatpush3.bf16.msra.mxu1 %v2887_v47  ;;  %2570 = vmatprep.subr.bf16.mxu0 %v2888_v48  ;;  %v2915_v47 = vld [vmem:[%s4230_s1 + $0x1b8] sm:$0xff]   ;;  %v38_v48 = vld [vmem:[%s4231_s0 + $0x28] sm:$0xff]  ;;  %v101_v29 = vld [vmem:[%s4231_s0 + $0x220] sm:$0xff] }
  0x26   :  { %2610 = vmatprep.subr.bf16.mxu1 %v2889_v49  ;;  %1296 = vmatprep.mubr.bf16.mxu0 %v178_v56  ;;  %v54_v49 = vld [vmem:[%s4231_s0 + $0xa8] sm:$0xff]  ;;  %v39_v56 = vld [vmem:[%s4231_s0 + $0x30] sm:$0xff]  ;;  %v117_v30 = vld [vmem:[%s4231_s0 + $0x2a0] sm:$0xff] }
  0x27   :  { %1361 = vmatprep.mubr.bf16.mxu1 %v180_v57  ;;  %v166_v52 = vpack.c.bf16 %v54_v49, %v38_v48  ;;  %v165_v57 = vpack.c.bf16 %v53_v55, %v37_v54  ;;  %v167_v59 = vpack.c.bf16 %v55_v58, %v39_v56  ;;  %v197_v32 = vpack.c.bf16 %v117_v30, %v101_v29  ;;  %v103_v33 = vld [vmem:[%s4231_s0 + $0x230] sm:$0xff]  ;;  %v2933_v37 = vld [vmem:[%s4230_s1 + $0x2e0] sm:$0xff]  }
  0x28   :  { %2571 = vmatpush3.bf16.msra.mxu0 %v2890_v50  ;;  %v40_v50 = vld [vmem:[%s4231_s0 + $0x38] sm:$0xff]  ;;  %v119_v34 = vld [vmem:[%s4231_s0 + $0x2b0] sm:$0xff]  ;;  %v2934_v38 = vld [vmem:[%s4230_s1 + $0x220] sm:$0xff]  }
  0x29   :  { %2611 = vmatpush3.bf16.msra.mxu1 %v2891_v51  ;;  %2572 = vmatprep.subr.bf16.mxu0 %v2892_v0  ;;  %v56_v51 = vld [vmem:[%s4231_s0 + $0xb8] sm:$0xff]  ;;  %v2920_v0 = vld [vmem:[%s4230_s1 + $0x248] sm:$0xff]   ;;  %v151_v54 = vld [vmem:[%s4231_s0 + $0x3b0] sm:$0xff] }
  0x2a   :  { %2612 = vmatprep.subr.bf16.mxu1 %v2893_v1  ;;  %v168_v53 = vpack.c.bf16 %v56_v51, %v40_v50  ;;  %v2921_v1 = vld [vmem:[%s4230_s1 + $0x2c8] sm:$0xff]   ;;  %v133_v50 = vld [vmem:[%s4231_s0 + $0x320] sm:$0xff]  ;;  %v2940_v56 = vld [vmem:[%s4230_s1 + $0x270] sm:$0xff]  }
  0x2b   :  { %1297 = vmatmul.mubr.bf16.gmra.mrb[4].mxu0 %v177_v61  ;;  %v2917_v61 = vld [vmem:[%s4230_s1 + $0x2c0] sm:$0xff]   ;;  %v2942_v58 = vld [vmem:[%s4230_s1 + $0x230] sm:$0xff]  }
  0x2c   :  { %1362 = vmatmul.mubr.bf16.gmra.mrb[4].mxu1 %v179_v63  ;;  %2573 = vmatpush3.bf16.msra.mxu0 %v2894_v2  ;;  %v2919_v63 = vld [vmem:[%s4230_s1 + $0x280] sm:$0xff]   ;;  %v2922_v2 = vld [vmem:[%s4230_s1 + $0x208] sm:$0xff]   ;;  %v75_v29 = vld [vmem:[%s4231_s0 + $0x150] sm:$0xff] }
  0x2d   :  { %2613 = vmatpush3.bf16.msra.mxu1 %v2895_v3  ;;  %2574 = vmatprep.subr.bf16.mxu0 %v2896_v4  ;;  %v2923_v3 = vld [vmem:[%s4230_s1 + $0x288] sm:$0xff]   ;;  %v149_v51 = vld [vmem:[%s4231_s0 + $0x3a0] sm:$0xff]  ;;  %v91_v30 = vld [vmem:[%s4231_s0 + $0x1d0] sm:$0xff] }
  0x2e   :  { %2614 = vmatprep.subr.bf16.mxu1 %v2897_v5  ;;  %1304 = vmatprep.mubr.bf16.mxu0 %v194_v10  ;;  %v70_v4 = vld [vmem:[%s4231_s0 + $0x128] sm:$0xff]  ;;  %v2948_v12 = vld [vmem:[%s4230_s1 + $0x340] sm:$0xff]  }
  0x2f   :  { %1369 = vmatprep.mubr.bf16.mxu1 %v196_v14  ;;  %v86_v5 = vld [vmem:[%s4231_s0 + $0x1a8] sm:$0xff]  ;;  %v181_v14 = vpack.c.bf16 %v85_v11, %v69_v9  ;;  %v59_v9 = vld [vmem:[%s4231_s0 + $0xd0] sm:$0xff]  ;;  %v2949_v13 = vld [vmem:[%s4230_s1 + $0x3c0] sm:$0xff]  }
  0x30   :  { %2575 = vmatpush3.bf16.msra.mxu0 %v2898_v6  ;;  %v182_v6 = vpack.c.bf16 %v86_v5, %v70_v4  ;;  %v60_v4 = vld [vmem:[%s4231_s0 + $0xd8] sm:$0xff]  ;;  %v41_v5 = vld [vmem:[%s4231_s0 + $0x40] sm:$0xff] }
  0x31   :  { %2615 = vmatpush3.bf16.msra.mxu1 %v2899_v7  ;;  %2576 = vmatprep.subr.bf16.mxu0 %v2900_v20  ;;  %v72_v7 = vld [vmem:[%s4231_s0 + $0x138] sm:$0xff] }
  0x32   :  { %2616 = vmatprep.subr.bf16.mxu1 %v2901_v21  ;;  %v184_v10 = vpack.c.bf16 %v88_v8, %v72_v7  ;;  %v2928_v20 = vld [vmem:[%s4230_s1 + $0x258] sm:$0xff]   ;;  %v57_v7 = vld [vmem:[%s4231_s0 + $0xc0] sm:$0xff]  ;;  %v43_v8 = vld [vmem:[%s4231_s0 + $0x50] sm:$0xff] }
  0x33   :  { %1305 = vmatmul.mubr.bf16.gmra.mrb[8].mxu0 %v193_v18  ;;  %v2926_v18 = vld [vmem:[%s4230_s1 + $0x210] sm:$0xff]   ;;  %v2929_v21 = vld [vmem:[%s4230_s1 + $0x2d8] sm:$0xff]   ;;  %v171_v11 = vpack.c.bf16 %v59_v9, %v43_v8 }
  0x34   :  { %1370 = vmatmul.mubr.bf16.gmra.mrb[8].mxu1 %v195_v19  ;;  %2577 = vmatpush3.bf16.msra.mxu0 %v2902_v22  ;;  %v2927_v19 = vld [vmem:[%s4230_s1 + $0x290] sm:$0xff]   ;;  %v2930_v22 = vld [vmem:[%s4230_s1 + $0x218] sm:$0xff]  }
  0x35   :  { %2617 = vmatpush3.bf16.msra.mxu1 %v2903_v23  ;;  %2578 = vmatprep.subr.bf16.mxu0 %v2904_v24  ;;  %v2931_v23 = vld [vmem:[%s4230_s1 + $0x298] sm:$0xff]   ;;  %v102_v24 = vld [vmem:[%s4231_s0 + $0x228] sm:$0xff]  ;;  %v2972_v8 = vld [vmem:[%s4230_s1 + $0x370] sm:$0xff]  }
  0x36   :  { %2618 = vmatprep.subr.bf16.mxu1 %v2905_v25  ;;  %1312 = vmatprep.mubr.bf16.mxu0 %v210_v31  ;;  %v118_v25 = vld [vmem:[%s4231_s0 + $0x2a8] sm:$0xff]  ;;  %v2973_v9 = vld [vmem:[%s4230_s1 + $0x3f0] sm:$0xff]  }
  0x37   :  { %1377 = vmatprep.mubr.bf16.mxu1 %v212_v35  ;;  %v199_v35 = vpack.c.bf16 %v119_v34, %v103_v33  ;;  %v2957_v33 = vld [vmem:[%s4230_s1 + $0x3d0] sm:$0xff]  }
  0x38   :  { %2579 = vmatpush3.bf16.msra.mxu0 %v2906_v26  ;;  %v104_v26 = vld [vmem:[%s4231_s0 + $0x238] sm:$0xff]  ;;  %v2958_v34 = vld [vmem:[%s4230_s1 + $0x310] sm:$0xff]  }
  0x39   :  { %2619 = vmatpush3.bf16.msra.mxu1 %v2907_v27  ;;  %2580 = vmatprep.subr.bf16.mxu0 %v2908_v40  ;;  %v198_v27 = vpack.c.bf16 %v118_v25, %v102_v24  ;;  %v200_v31 = vpack.c.bf16 %v120_v28, %v104_v26  ;;  %v2936_v40 = vld [vmem:[%s4230_s1 + $0x268] sm:$0xff]   ;;  %v92_v24 = vld [vmem:[%s4231_s0 + $0x1d8] sm:$0xff]  ;;  %v73_v25 = vld [vmem:[%s4231_s0 + $0x140] sm:$0xff] }
  0x3a   :  { %2620 = vmatprep.subr.bf16.mxu1 %v2909_v41  ;;  %v2937_v41 = vld [vmem:[%s4230_s1 + $0x2e8] sm:$0xff]   ;;  %v89_v26 = vld [vmem:[%s4231_s0 + $0x1c0] sm:$0xff] }
  0x3b   :  { %1313 = vmatmul.mubr.bf16.gmra.mrb[12].mxu0 %v209_v36  ;;  %v2932_v36 = vld [vmem:[%s4230_s1 + $0x260] sm:$0xff]   ;;  %v185_v28 = vpack.c.bf16 %v89_v26, %v73_v25  ;;  %v47_v25 = vld [vmem:[%s4231_s0 + $0x70] sm:$0xff] }
  0x3c   :  { %1378 = vmatmul.mubr.bf16.gmra.mrb[12].mxu1 %v211_v39  ;;  %2581 = vmatpush3.bf16.msra.mxu0 %v2910_v42  ;;  %v2935_v39 = vld [vmem:[%s4230_s1 + $0x2a0] sm:$0xff]   ;;  %v2938_v42 = vld [vmem:[%s4230_s1 + $0x228] sm:$0xff]   ;;  %v63_v26 = vld [vmem:[%s4231_s0 + $0xf0] sm:$0xff] }
  0x3d   :  { %2621 = vmatpush3.bf16.msra.mxu1 %v2911_v43  ;;  %2582 = vmatprep.subr.bf16.mxu0 %v2912_v44  ;;  %v2939_v43 = vld [vmem:[%s4230_s1 + $0x2a8] sm:$0xff]  }
  0x3e   :  { %2622 = vmatprep.subr.bf16.mxu1 %v2913_v45  ;;  %1418 = vmatprep.mubr.bf16.mxu0 %v166_v52  ;;  %v134_v44 = vld [vmem:[%s4231_s0 + $0x328] sm:$0xff]  ;;  %v135_v52 = vld [vmem:[%s4231_s0 + $0x330] sm:$0xff] }
  0x3f   :  { %1483 = vmatprep.mubr.bf16.mxu1 %v168_v53  ;;  %v150_v45 = vld [vmem:[%s4231_s0 + $0x3a8] sm:$0xff]  ;;  %v213_v53 = vpack.c.bf16 %v149_v51, %v133_v50  ;;  %v215_v55 = vpack.c.bf16 %v151_v54, %v135_v52  ;;  %v123_v50 = vld [vmem:[%s4231_s0 + $0x2d0] sm:$0xff]  ;;  %v2964_v52 = vld [vmem:[%s4230_s1 + $0x360] sm:$0xff]  }
  0x40   :  { %2583 = vmatpush3.bf16.msra.mxu0 %v2914_v46  ;;  %v136_v46 = vld [vmem:[%s4231_s0 + $0x338] sm:$0xff]  ;;  %v214_v48 = vpack.c.bf16 %v150_v45, %v134_v44  ;;  %v2966_v54 = vld [vmem:[%s4230_s1 + $0x320] sm:$0xff]  }
  0x41   :  { %2623 = vmatpush3.bf16.msra.mxu1 %v2915_v47  ;;  %2648 = vmatprep.subr.bf16.mxu0 %v2916_v60  ;;  %v152_v47 = vld [vmem:[%s4231_s0 + $0x3b8] sm:$0xff] }
  0x42   :  { %2688 = vmatprep.subr.bf16.mxu1 %v2917_v61  ;;  %v216_v49 = vpack.c.bf16 %v152_v47, %v136_v46  ;;  %v2944_v60 = vld [vmem:[%s4230_s1 + $0x278] sm:$0xff]   ;;  %v105_v46 = vld [vmem:[%s4231_s0 + $0x240] sm:$0xff] }
  0x43   :  { %1419 = vmatmul.mubr.bf16.vlgmr.msra.gmra.mrb[16].mxu0 %v165_v57  ;;  %v2941_v57 = vld [vmem:[%s4230_s1 + $0x2f0] sm:$0xff]   ;;  %v2945_v61 = vld [vmem:[%s4230_s1 + $0x2f8] sm:$0xff]   ;;  %v121_v47 = vld [vmem:[%s4231_s0 + $0x2c0] sm:$0xff] }
  0x44   :  { %1484 = vmatmul.mubr.bf16.vlgmr.msra.gmra.mrb[16].mxu1 %v167_v59  ;;  %2649 = vmatpush3.bf16.msra.mxu0 %v2918_v62  ;;  %v2943_v59 = vld [vmem:[%s4230_s1 + $0x2b0] sm:$0xff]   ;;  %v2946_v62 = vld [vmem:[%s4230_s1 + $0x238] sm:$0xff]  }
  0x45   :  { %2689 = vmatpush3.bf16.msra.mxu1 %v2919_v63  ;;  %2650 = vmatprep.subr.bf16.mxu0 %v2920_v0  ;;  %v2947_v63 = vld [vmem:[%s4230_s1 + $0x2b8] sm:$0xff]   ;;  %v42_v0 = vld [vmem:[%s4231_s0 + $0x48] sm:$0xff] }
  0x46   :  { %2690 = vmatprep.subr.bf16.mxu1 %v2921_v1  ;;  %1426 = vmatprep.mubr.bf16.mxu0 %v182_v6  ;;  %v58_v1 = vld [vmem:[%s4231_s0 + $0xc8] sm:$0xff] }
  0x47   :  { %1491 = vmatprep.mubr.bf16.mxu1 %v184_v10  ;;  %v169_v10 = vpack.c.bf16 %v57_v7, %v41_v5  ;;  %v155_v5 = vld [vmem:[%s4231_s0 + $0x3d0] sm:$0xff] }
  0x48   :  { %2651 = vmatpush3.bf16.msra.mxu0 %v2922_v2  ;;  %v170_v2 = vpack.c.bf16 %v58_v1, %v42_v0  ;;  %v156_v0 = vld [vmem:[%s4231_s0 + $0x3d8] sm:$0xff]  ;;  %v137_v1 = vld [vmem:[%s4231_s0 + $0x340] sm:$0xff] }
  0x49   :  { %2691 = vmatpush3.bf16.msra.mxu1 %v2923_v3  ;;  %2652 = vmatprep.subr.bf16.mxu0 %v2924_v16  ;;  %v44_v3 = vld [vmem:[%s4231_s0 + $0x58] sm:$0xff]  ;;  %v2952_v16 = vld [vmem:[%s4230_s1 + $0x348] sm:$0xff]  }
  0x4a   :  { %2692 = vmatprep.subr.bf16.mxu1 %v2925_v17  ;;  %v172_v6 = vpack.c.bf16 %v60_v4, %v44_v3  ;;  %v2953_v17 = vld [vmem:[%s4230_s1 + $0x3c8] sm:$0xff]   ;;  %v153_v3 = vld [vmem:[%s4231_s0 + $0x3c0] sm:$0xff]  ;;  %v139_v4 = vld [vmem:[%s4231_s0 + $0x350] sm:$0xff] }
  0x4b   :  { %1427 = vmatmul.mubr.bf16.gmra.mrb[20].mxu0 %v181_v14  ;;  %v2950_v14 = vld [vmem:[%s4230_s1 + $0x300] sm:$0xff]   ;;  %v219_v7 = vpack.c.bf16 %v155_v5, %v139_v4 }
  0x4c   :  { %1492 = vmatmul.mubr.bf16.gmra.mrb[20].mxu1 %v183_v15  ;;  %2653 = vmatpush3.bf16.msra.mxu0 %v2926_v18  ;;  %v2951_v15 = vld [vmem:[%s4230_s1 + $0x380] sm:$0xff]   ;;  %v2954_v18 = vld [vmem:[%s4230_s1 + $0x308] sm:$0xff]  }
  0x4d   :  { %2693 = vmatpush3.bf16.msra.mxu1 %v2927_v19  ;;  %2654 = vmatprep.subr.bf16.mxu0 %v2928_v20  ;;  %v2955_v19 = vld [vmem:[%s4230_s1 + $0x388] sm:$0xff]  }
  0x4e   :  { %2694 = vmatprep.subr.bf16.mxu1 %v2929_v21  ;;  %1434 = vmatprep.mubr.bf16.mxu0 %v198_v27  ;;  %v74_v20 = vld [vmem:[%s4231_s0 + $0x148] sm:$0xff] }
  0x4f   :  { %1499 = vmatprep.mubr.bf16.mxu1 %v200_v31  ;;  %v90_v21 = vld [vmem:[%s4231_s0 + $0x1c8] sm:$0xff]  ;;  %v187_v31 = vpack.c.bf16 %v91_v30, %v75_v29  ;;  %v80_v30 = vld [vmem:[%s4231_s0 + $0x178] sm:$0xff] }
  0x50   :  { %2655 = vmatpush3.bf16.msra.mxu0 %v2930_v22  ;;  %v76_v22 = vld [vmem:[%s4231_s0 + $0x158] sm:$0xff]  ;;  %v94_v29 = vld [vmem:[%s4231_s0 + $0x1e8] sm:$0xff] }
  0x51   :  { %2695 = vmatpush3.bf16.msra.mxu1 %v2931_v23  ;;  %2656 = vmatprep.subr.bf16.mxu0 %v2932_v36  ;;  %v186_v23 = vpack.c.bf16 %v90_v21, %v74_v20  ;;  %v188_v27 = vpack.c.bf16 %v92_v24, %v76_v22  ;;  %v2960_v36 = vld [vmem:[%s4230_s1 + $0x358] sm:$0xff]   ;;  %v45_v21 = vld [vmem:[%s4231_s0 + $0x60] sm:$0xff] }
  0x52   :  { %2696 = vmatprep.subr.bf16.mxu1 %v2933_v37  ;;  %v2961_v37 = vld [vmem:[%s4230_s1 + $0x3d8] sm:$0xff]   ;;  %v61_v22 = vld [vmem:[%s4231_s0 + $0xe0] sm:$0xff] }
  0x53   :  { %1435 = vmatmul.mubr.bf16.gmra.mrb[24].mxu0 %v197_v32  ;;  %v2956_v32 = vld [vmem:[%s4230_s1 + $0x350] sm:$0xff]   ;;  %v64_v20 = vld [vmem:[%s4231_s0 + $0xf8] sm:$0xff]  ;;  %v173_v24 = vpack.c.bf16 %v61_v22, %v45_v21 }
  0x54   :  { %1500 = vmatmul.mubr.bf16.gmra.mrb[24].mxu1 %v199_v35  ;;  %2657 = vmatpush3.bf16.msra.mxu0 %v2934_v38  ;;  %v2959_v35 = vld [vmem:[%s4230_s1 + $0x390] sm:$0xff]   ;;  %v2962_v38 = vld [vmem:[%s4230_s1 + $0x318] sm:$0xff]  }
  0x55   :  { %2697 = vmatpush3.bf16.msra.mxu1 %v2935_v39  ;;  %2658 = vmatprep.subr.bf16.mxu0 %v2936_v40  ;;  %v2963_v39 = vld [vmem:[%s4230_s1 + $0x398] sm:$0xff]   ;;  %v106_v40 = vld [vmem:[%s4231_s0 + $0x248] sm:$0xff] }
  0x56   :  { %2698 = vmatprep.subr.bf16.mxu1 %v2937_v41  ;;  %1442 = vmatprep.mubr.bf16.mxu0 %v214_v48  ;;  %v122_v41 = vld [vmem:[%s4231_s0 + $0x2c8] sm:$0xff]  ;;  %v107_v48 = vld [vmem:[%s4231_s0 + $0x250] sm:$0xff] }
  0x57   :  { %1507 = vmatprep.mubr.bf16.mxu1 %v216_v49  ;;  %v202_v44 = vpack.c.bf16 %v122_v41, %v106_v40  ;;  %v201_v49 = vpack.c.bf16 %v121_v47, %v105_v46  ;;  %v203_v51 = vpack.c.bf16 %v123_v50, %v107_v48  ;;  %v112_v40 = vld [vmem:[%s4231_s0 + $0x278] sm:$0xff]  ;;  %v109_v46 = vld [vmem:[%s4231_s0 + $0x260] sm:$0xff]  ;;  %v111_v48 = vld [vmem:[%s4231_s0 + $0x270] sm:$0xff] }
  0x58   :  { %2659 = vmatpush3.bf16.msra.mxu0 %v2938_v42  ;;  %v108_v42 = vld [vmem:[%s4231_s0 + $0x258] sm:$0xff]  ;;  %v125_v47 = vld [vmem:[%s4231_s0 + $0x2e0] sm:$0xff]  ;;  %v142_v50 = vld [vmem:[%s4231_s0 + $0x368] sm:$0xff] }
  0x59   :  { %2699 = vmatpush3.bf16.msra.mxu1 %v2939_v43  ;;  %2660 = vmatprep.subr.bf16.mxu0 %v2940_v56  ;;  %v124_v43 = vld [vmem:[%s4231_s0 + $0x2d8] sm:$0xff]  ;;  %v2968_v56 = vld [vmem:[%s4230_s1 + $0x368] sm:$0xff]  }
  0x5a   :  { %2700 = vmatprep.subr.bf16.mxu1 %v2941_v57  ;;  %v204_v45 = vpack.c.bf16 %v124_v43, %v108_v42  ;;  %v2969_v57 = vld [vmem:[%s4230_s1 + $0x3e8] sm:$0xff]   ;;  %v128_v41 = vld [vmem:[%s4231_s0 + $0x2f8] sm:$0xff] }
  0x5b   :  { %1443 = vmatmul.mubr.bf16.gmra.mrb[28].mxu0 %v213_v53  ;;  %v2965_v53 = vld [vmem:[%s4230_s1 + $0x3e0] sm:$0xff]  }
  0x5c   :  { %1508 = vmatmul.mubr.bf16.gmra.mrb[28].mxu1 %v215_v55  ;;  %2661 = vmatpush3.bf16.msra.mxu0 %v2942_v58  ;;  %v2967_v55 = vld [vmem:[%s4230_s1 + $0x3a0] sm:$0xff]   ;;  %v2970_v58 = vld [vmem:[%s4230_s1 + $0x328] sm:$0xff]  }
  0x5d   :  { %2701 = vmatpush3.bf16.msra.mxu1 %v2943_v59  ;;  %2662 = vmatprep.subr.bf16.mxu0 %v2944_v60  ;;  %v2971_v59 = vld [vmem:[%s4230_s1 + $0x3a8] sm:$0xff]  }
  0x5e   :  { %2702 = vmatprep.subr.bf16.mxu1 %v2945_v61  ;;  %1548 = vmatprep.mubr.bf16.mxu0 %v170_v2  ;;  %v138_v60 = vld [vmem:[%s4231_s0 + $0x348] sm:$0xff] }
  0x5f   :  { %1613 = vmatprep.mubr.bf16.mxu1 %v172_v6  ;;  %v154_v61 = vld [vmem:[%s4231_s0 + $0x3c8] sm:$0xff]  ;;  %v217_v6 = vpack.c.bf16 %v153_v3, %v137_v1  ;;  %v2980_v1 = vld [vmem:[%s4233_s3] sm:$0xff]  }
  0x60   :  { %2663 = vmatpush3.bf16.msra.mxu0 %v2946_v62  ;;  %v218_v62 = vpack.c.bf16 %v154_v61, %v138_v60  ;;  %v143_v60 = vld [vmem:[%s4231_s0 + $0x370] sm:$0xff] }
  0x61   :  { %2703 = vmatpush3.bf16.msra.mxu1 %v2947_v63  ;;  %2728 = vmatprep.subr.bf16.mxu0 %v2948_v12  ;;  %v140_v63 = vld [vmem:[%s4231_s0 + $0x358] sm:$0xff]  ;;  %v159_v61 = vld [vmem:[%s4231_s0 + $0x3f0] sm:$0xff] }
  0x62   :  { %2768 = vmatprep.subr.bf16.mxu1 %v2949_v13  ;;  %v220_v2 = vpack.c.bf16 %v156_v0, %v140_v63  ;;  %v2976_v12 = vld [vmem:[%s4230_s1 + $0x378] sm:$0xff]   ;;  %v223_v63 = vpack.c.bf16 %v159_v61, %v143_v60  ;;  %v3843_v0 = vld [vmem:[%s4232_s2] ss:$0 sm:$0xff] }
  0x63   :  { %1549 = vmatmul.mubr.bf16.vlgmr.msra.gmra.mrb[32].mxu0 %v169_v10  ;;  %v2974_v10 = vld [vmem:[%s4230_s1 + $0x330] sm:$0xff]   ;;  %v2977_v13 = vld [vmem:[%s4230_s1 + $0x3f8] sm:$0xff]  }
  0x64   :  { %1614 = vmatmul.mubr.bf16.vlgmr.msra.gmra.mrb[32].mxu1 %v171_v11  ;;  %2729 = vmatpush3.bf16.msra.mxu0 %v2950_v14  ;;  %v2975_v11 = vld [vmem:[%s4230_s1 + $0x3b0] sm:$0xff]   ;;  %v2978_v14 = vld [vmem:[%s4230_s1 + $0x338] sm:$0xff]  }
  0x65   :  { %2769 = vmatpush3.bf16.msra.mxu1 %v2951_v15  ;;  %2730 = vmatprep.subr.bf16.mxu0 %v2952_v16  ;;  %v2979_v15 = vld [vmem:[%s4230_s1 + $0x3b8] sm:$0xff]   ;;  %v46_v16 = vld [vmem:[%s4231_s0 + $0x68] sm:$0xff] }
  0x66   :  { %2770 = vmatprep.subr.bf16.mxu1 %v2953_v17  ;;  %1556 = vmatprep.mubr.bf16.mxu0 %v186_v23  ;;  %v62_v17 = vld [vmem:[%s4231_s0 + $0xe8] sm:$0xff] }
  0x67   :  { %1621 = vmatprep.mubr.bf16.mxu1 %v188_v27  ;;  %v78_v27 = vld [vmem:[%s4231_s0 + $0x168] sm:$0xff] }
  0x68   :  { %2731 = vmatpush3.bf16.msra.mxu0 %v2954_v18  ;;  %v48_v18 = vld [vmem:[%s4231_s0 + $0x78] sm:$0xff] }
  0x69   :  { %2771 = vmatpush3.bf16.msra.mxu1 %v2955_v19  ;;  %2732 = vmatprep.subr.bf16.mxu0 %v2956_v32  ;;  %v174_v19 = vpack.c.bf16 %v62_v17, %v46_v16  ;;  %v176_v23 = vpack.c.bf16 %v64_v20, %v48_v18  ;;  %v190_v32 = vpack.c.bf16 %v94_v29, %v78_v27  ;;  %v2981_v18 = vld [vmem:[%s4233_s3 + $0x8] sm:$0xff]  }
  0x6a   :  { %2772 = vmatprep.subr.bf16.mxu1 %v2957_v33 }
  0x6b   :  { %1557 = vmatmul.mubr.bf16.gmra.mrb[36].mxu0 %v185_v28  ;;  %v175_v28 = vpack.c.bf16 %v63_v26, %v47_v25  ;;  %v2982_v25 = vld [vmem:[%s4233_s3 + $0x10] sm:$0xff]  }
  0x6c   :  { %1622 = vmatmul.mubr.bf16.gmra.mrb[36].mxu1 %v187_v31  ;;  %2733 = vmatpush3.bf16.msra.mxu0 %v2958_v34  ;;  %v96_v31 = vld [vmem:[%s4231_s0 + $0x1f8] sm:$0xff]  ;;  %v77_v34 = vld [vmem:[%s4231_s0 + $0x160] sm:$0xff] }
  0x6d   :  { %2773 = vmatpush3.bf16.msra.mxu1 %v2959_v35  ;;  %2734 = vmatprep.subr.bf16.mxu0 %v2960_v36  ;;  %v192_v33 = vpack.c.bf16 %v96_v31, %v80_v30  ;;  %v93_v35 = vld [vmem:[%s4231_s0 + $0x1e0] sm:$0xff]  ;;  %v79_v36 = vld [vmem:[%s4231_s0 + $0x170] sm:$0xff] }
  0x6e   :  { %2774 = vmatprep.subr.bf16.mxu1 %v2961_v37  ;;  %1564 = vmatprep.mubr.bf16.mxu0 %v202_v44  ;;  %v95_v37 = vld [vmem:[%s4231_s0 + $0x1f0] sm:$0xff]  ;;  %v189_v42 = vpack.c.bf16 %v93_v35, %v77_v34  ;;  %v2983_v35 = vld [vmem:[%s4233_s3 + $0x18] sm:$0xff]  }
  0x6f   :  { %1629 = vmatprep.mubr.bf16.mxu1 %v204_v45  ;;  %v191_v43 = vpack.c.bf16 %v95_v37, %v79_v36  ;;  %v208_v45 = vpack.c.bf16 %v128_v41, %v112_v40 }
  0x70   :  { %2735 = vmatpush3.bf16.msra.mxu0 %v2962_v38  ;;  %v110_v38 = vld [vmem:[%s4231_s0 + $0x268] sm:$0xff] }
  0x71   :  { %2775 = vmatpush3.bf16.msra.mxu1 %v2963_v39  ;;  %2736 = vmatprep.subr.bf16.mxu0 %v2964_v52  ;;  %v126_v39 = vld [vmem:[%s4231_s0 + $0x2e8] sm:$0xff]  ;;  %v144_v52 = vld [vmem:[%s4231_s0 + $0x378] sm:$0xff] }
  0x72   :  { %2776 = vmatprep.subr.bf16.mxu1 %v2965_v53  ;;  %v206_v44 = vpack.c.bf16 %v126_v39, %v110_v38  ;;  %v160_v53 = vld [vmem:[%s4231_s0 + $0x3f8] sm:$0xff] }
  0x73   :  { %1565 = vmatmul.mubr.bf16.gmra.mrb[40].mxu0 %v201_v49  ;;  %v127_v49 = vld [vmem:[%s4231_s0 + $0x2f0] sm:$0xff] }
  0x74   :  { %1630 = vmatmul.mubr.bf16.gmra.mrb[40].mxu1 %v203_v51  ;;  %2737 = vmatpush3.bf16.msra.mxu0 %v2966_v54  ;;  %v158_v51 = vld [vmem:[%s4231_s0 + $0x3e8] sm:$0xff]  ;;  %v205_v54 = vpack.c.bf16 %v125_v47, %v109_v46 }
  0x75   :  { %2777 = vmatpush3.bf16.msra.mxu1 %v2967_v55  ;;  %2738 = vmatprep.subr.bf16.mxu0 %v2968_v56  ;;  %v207_v55 = vpack.c.bf16 %v127_v49, %v111_v48  ;;  %v222_v56 = vpack.c.bf16 %v158_v51, %v142_v50 }
  0x76   :  { %2778 = vmatprep.subr.bf16.mxu1 %v2969_v57  ;;  %1572 = vmatprep.mubr.bf16.mxu0 %v218_v62  ;;  %v224_v57 = vpack.c.bf16 %v160_v53, %v144_v52 }
  0x77   :  { %1637 = vmatprep.mubr.bf16.mxu1 %v220_v2 }
  0x78   :  { %2739 = vmatpush3.bf16.msra.mxu0 %v2970_v58  ;;  %v141_v58 = vld [vmem:[%s4231_s0 + $0x360] sm:$0xff] }
  0x79   :  { %2779 = vmatpush3.bf16.msra.mxu1 %v2971_v59  ;;  %2740 = vmatprep.subr.bf16.mxu0 %v2972_v8  ;;  %v157_v59 = vld [vmem:[%s4231_s0 + $0x3e0] sm:$0xff] }
  0x7a   :  { %2780 = vmatprep.subr.bf16.mxu1 %v2973_v9  ;;  %v221_v62 = vpack.c.bf16 %v157_v59, %v141_v58 }
  0x7b   :  { %1573 = vmatmul.mubr.bf16.gmra.mrb[44].mxu0 %v217_v6 }
  0x7c   :  { %1638 = vmatmul.mubr.bf16.gmra.mrb[44].mxu1 %v219_v7  ;;  %2741 = vmatpush3.bf16.msra.mxu0 %v2974_v10 }
  0x7d   :  { %2781 = vmatpush3.bf16.msra.mxu1 %v2975_v11  ;;  %2742 = vmatprep.subr.bf16.mxu0 %v2976_v12 }
  0x7e   :  { %2782 = vmatprep.subr.bf16.mxu1 %v2977_v13  ;;  %1678 = vmatprep.mubr.bf16.mxu0 %v174_v19 }
  0x7f   :  { %1743 = vmatprep.mubr.bf16.mxu1 %v176_v23 }
  0x80   :  { %2743 = vmatpush3.bf16.msra.mxu0 %v2978_v14 }
  0x81   :  { %2783 = vmatpush3.bf16.msra.mxu1 %v2979_v15  ;;  %2822 = vmatprep.subr.bf16.mxu0 %v2980_v1 }
  0x83   :  { %1679 = vmatmul.mubr.bf16.vlgmr.msra.gmra.mrb[48].mxu0 %v173_v24 }
  0x84   :  { %1744 = vmatmul.mubr.bf16.vlgmr.msra.gmra.mrb[48].mxu1 %v175_v28  ;;  %1686 = vmatprep.mubr.bf16.mxu0 %v190_v32 }
  0x85   :  { %1751 = vmatprep.mubr.bf16.mxu1 %v192_v33  ;;  %2823 = vmatpush3.bf16.msra.mxu0 %v2980_v1 }
  0x86   :  { %2824 = vmatprep.subr.bf16.mxu0 %v2981_v18 }
  0x89   :  { %2825 = vmatpush3.bf16.msra.mxu0 %v2981_v18  ;;  %v2144_v18 = vld [vmem:[%s4234_s8 + $0x28] sm:$0xff] }
  0x8a   :  { %2826 = vmatprep.subr.bf16.mxu0 %v2982_v25 }
  0x8b   :  { %1687 = vmatmul.mubr.bf16.gmra.mrb[52].mxu0 %v189_v42 }
  0x8c   :  { %1752 = vmatmul.mubr.bf16.gmra.mrb[52].mxu1 %v191_v43  ;;  %1694 = vmatprep.mubr.bf16.mxu0 %v206_v44 }
  0x8d   :  { %1759 = vmatprep.mubr.bf16.mxu1 %v208_v45  ;;  %2827 = vmatpush3.bf16.msra.mxu0 %v2982_v25 }
  0x8e   :  { %2828 = vmatprep.subr.bf16.mxu0 %v2983_v35 }
  0x91   :  { %2829 = vmatpush3.bf16.msra.mxu0 %v2983_v35 }
  0x93   :  { %1695 = vmatmul.mubr.bf16.gmra.mrb[56].mxu0 %v205_v54 }
  0x94   :  { %1760 = vmatmul.mubr.bf16.gmra.mrb[56].mxu1 %v207_v55  ;;  %1702 = vmatprep.mubr.bf16.mxu0 %v222_v56 }
  0x95   :  { %1767 = vmatprep.mubr.bf16.mxu1 %v224_v57 }
  0x9b   :  { %1703 = vmatmul.mubr.bf16.gmra.mrb[60].mxu0 %v221_v62 }
  0x9c   :  { %1768 = vmatmul.mubr.bf16.gmra.mrb[60].mxu1 %v223_v63 }
  0xf6   :  { %v2504_v2 = vpop.f32.mrb[0].mxu0 }
  0xf7   :  { %v2544_v3 = vpop.f32.mrb[0].mxu1  ;;  %v2505_v4 = vpop.f32.mrb[1].mxu0 }
  0xf8   :  { %v2506_v5 = vadd.f32 %v2505_v4, %v2504_v2  ;;  %v2545_v6 = vpop.f32.mrb[1].mxu1  ;;  %v2507_v7 = vpop.f32.mrb[2].mxu0 }
  0xf9   :  { %v2546_v8 = vadd.f32 %v2545_v6, %v2544_v3  ;;  %v2547_v9 = vpop.f32.mrb[2].mxu1  ;;  %v2508_v10 = vpop.f32.mrb[3].mxu0  ;;  %v2139_v6 = vld [vmem:[%s4234_s8] sm:$0xff] }
  0xfa   :  { %v1291_v11 = vadd.f32 %v2506_v5, %v3843_v0  ;;  %v2509_v12 = vadd.f32 %v2508_v10, %v2507_v7  ;;  %v2548_v13 = vpop.f32.mrb[3].mxu1  ;;  %v2141_v5 = vld [vmem:[%s4234_s8 + $0x10] sm:$0xff]  ;;  %2155 = vrot.lane.b32.xlu0 %v2139_v6, %s3020_s24 }
  0xfb   :  { %v2549_v14 = vadd.f32 %v2548_v13, %v2547_v9  ;;  %2159 = vrot.lane.b32.xlu1 %v2141_v5, %s3020_s24 }
  0xfc   :  { %v3849_v15 = vadd.f32 %v2546_v8, %v1291_v11  ;;  %v1294_v16 = vadd.f32 %v2509_v12, %v3843_v0  ;;  %v2142_v8 = vld [vmem:[%s4234_s8 + $0x18] sm:$0xff] }
  0xfe   :  { %v3852_v17 = vadd.f32 %v2549_v14, %v1294_v16  ;;  %v2510_v19 = vpop.f32.mrb[4].mxu0  ;;  %v2143_v16 = vld [vmem:[%s4234_s8 + $0x20] sm:$0xff] }
  0xff   :  { %v2550_v20 = vpop.f32.mrb[4].mxu1  ;;  %v2511_v21 = vpop.f32.mrb[5].mxu0  ;;  %2161 = vrot.lane.b32.xlu1 %v2142_v8, %s3020_s24 }
 0x100   :  { %v2512_v22 = vadd.f32 %v2511_v21, %v2510_v19  ;;  %v2551_v23 = vpop.f32.mrb[5].mxu1  ;;  %v2513_v24 = vpop.f32.mrb[6].mxu0 }
 0x101   :  { %v2552_v26 = vadd.f32 %v2551_v23, %v2550_v20  ;;  %v2553_v27 = vpop.f32.mrb[6].mxu1  ;;  %v2514_v28 = vpop.f32.mrb[7].mxu0 }
 0x102   :  { %v1299_v29 = vadd.f32 %v2512_v22, %v3843_v0  ;;  %v2515_v30 = vadd.f32 %v2514_v28, %v2513_v24  ;;  %v2554_v31 = vpop.f32.mrb[7].mxu1  ;;  %v2145_v28 = vld [vmem:[%s4234_s8 + $0x30] sm:$0xff] }
 0x103   :  { %v2555_v32 = vadd.f32 %v2554_v31, %v2553_v27  ;;  %2165 = vrot.lane.b32.xlu1 %v2144_v18, %s3020_s24 }
 0x104   :  { %v3861_v33 = vadd.f32 %v2552_v26, %v1299_v29  ;;  %v1302_v34 = vadd.f32 %v2515_v30, %v3843_v0  ;;  %v2146_v29 = vld [vmem:[%s4234_s8 + $0x38] sm:$0xff] }
 0x106   :  { %v3867_v36 = vadd.f32 %v2555_v32, %v1302_v34  ;;  %v2516_v37 = vpop.f32.mrb[8].mxu0 }
 0x107   :  { %v2556_v38 = vpop.f32.mrb[8].mxu1  ;;  %v2517_v39 = vpop.f32.mrb[9].mxu0  ;;  %2169 = vrot.lane.b32.xlu1 %v2146_v29, %s3020_s24 }
 0x108   :  { %v2557_v40 = vpop.f32.mrb[9].mxu1  ;;  %v2518_v41 = vadd.f32 %v2517_v39, %v2516_v37  ;;  %v2519_v43 = vpop.f32.mrb[10].mxu0 }
 0x109   :  { %v2558_v42 = vadd.f32 %v2557_v40, %v2556_v38  ;;  %v2559_v44 = vpop.f32.mrb[10].mxu1  ;;  %v2520_v45 = vpop.f32.mrb[11].mxu0 }
 0x10a   :  { %v2560_v46 = vpop.f32.mrb[11].mxu1  ;;  %v1307_v47 = vadd.f32 %v2518_v41, %v3843_v0  ;;  %v2521_v48 = vadd.f32 %v2520_v45, %v2519_v43 }
 0x10b   :  { %v2561_v49 = vadd.f32 %v2560_v46, %v2559_v44 }
 0x10c   :  { %v3870_v50 = vadd.f32 %v2558_v42, %v1307_v47  ;;  %v1310_v51 = vadd.f32 %v2521_v48, %v3843_v0 }
 0x10e   :  { %v3873_v52 = vadd.f32 %v2561_v49, %v1310_v51  ;;  %v2522_v53 = vpop.f32.mrb[12].mxu0 }
 0x10f   :  { %v2562_v54 = vpop.f32.mrb[12].mxu1  ;;  %v2523_v55 = vpop.f32.mrb[13].mxu0 }
 0x110   :  { %v2524_v56 = vadd.f32 %v2523_v55, %v2522_v53  ;;  %v2563_v57 = vpop.f32.mrb[13].mxu1  ;;  %v2525_v58 = vpop.f32.mrb[14].mxu0 }
 0x111   :  { %v2564_v59 = vadd.f32 %v2563_v57, %v2562_v54  ;;  %v2565_v60 = vpop.f32.mrb[14].mxu1  ;;  %v2526_v61 = vpop.f32.mrb[15].mxu0 }
 0x112   :  { %v1315_v62 = vadd.f32 %v2524_v56, %v3843_v0  ;;  %v2527_v63 = vadd.f32 %v2526_v61, %v2525_v58  ;;  %v2566_v1 = vpop.f32.mrb[15].mxu1 }
 0x113   :  { %v2567_v2 = vadd.f32 %v2566_v1, %v2565_v60 }
 0x114   :  { %v3876_v3 = vadd.f32 %v2564_v59, %v1315_v62  ;;  %v1318_v4 = vadd.f32 %v2527_v63, %v3843_v0  ;;  %v2140_v0 = vld [vmem:[%s4234_s8 + $0x8] sm:$0xff] }
 0x115   :  { %2157 = vrot.lane.b32.xlu0 %v2140_v0, %s3020_s24 }
 0x116   :  { %v3885_v7 = vadd.f32 %v2567_v2, %v1318_v4  ;;  %v2584_v9 = vpop.f32.mrb[16].mxu0 }
 0x117   :  { %v2624_v10 = vpop.f32.mrb[16].mxu1  ;;  %v2585_v11 = vpop.f32.mrb[17].mxu0 }
 0x118   :  { %v2586_v12 = vadd.f32 %v2585_v11, %v2584_v9  ;;  %v2625_v13 = vpop.f32.mrb[17].mxu1  ;;  %v2587_v14 = vpop.f32.mrb[18].mxu0 }
 0x119   :  { %v2626_v19 = vadd.f32 %v2625_v13, %v2624_v10  ;;  %v2627_v20 = vpop.f32.mrb[18].mxu1  ;;  %v2588_v21 = vpop.f32.mrb[19].mxu0  ;;  %2163 = vrot.lane.b32.xlu0 %v2143_v16, %s3020_s24 }
 0x11a   :  { %v1421_v22 = vadd.f32 %v2586_v12, %v3849_v15  ;;  %v2589_v23 = vadd.f32 %v2588_v21, %v2587_v14  ;;  %v2628_v24 = vpop.f32.mrb[19].mxu1 }
 0x11b   :  { %v2629_v25 = vadd.f32 %v2628_v24, %v2627_v20 }
 0x11c   :  { %v3900_v26 = vadd.f32 %v2626_v19, %v1421_v22  ;;  %v1424_v27 = vadd.f32 %v2589_v23, %v3852_v17 }
 0x11d   :  { %2167 = vrot.lane.b32.xlu0 %v2145_v28, %s3020_s24 }
 0x11e   :  { %v3909_v30 = vadd.f32 %v2629_v25, %v1424_v27  ;;  %v2590_v15 = vpop.f32.mrb[20].mxu0 }
 0x11f   :  { %v2630_v31 = vpop.f32.mrb[20].mxu1  ;;  %v2591_v32 = vpop.f32.mrb[21].mxu0 }
 0x120   :  { %v2631_v34 = vpop.f32.mrb[21].mxu1  ;;  %v2592_v35 = vadd.f32 %v2591_v32, %v2590_v15  ;;  %v2593_v38 = vpop.f32.mrb[22].mxu0 }
 0x121   :  { %v2632_v37 = vadd.f32 %v2631_v34, %v2630_v31  ;;  %v2633_v17 = vpop.f32.mrb[22].mxu1  ;;  %v2594_v39 = vpop.f32.mrb[23].mxu0 }
 0x122   :  { %v2634_v40 = vpop.f32.mrb[23].mxu1  ;;  %v1429_v41 = vadd.f32 %v2592_v35, %v3861_v33  ;;  %v2595_v42 = vadd.f32 %v2594_v39, %v2593_v38 }
 0x123   :  { %v2635_v43 = vadd.f32 %v2634_v40, %v2633_v17 }
 0x124   :  { %v1494_v44 = vadd.f32 %v2632_v37, %v1429_v41  ;;  %v1432_v45 = vadd.f32 %v2595_v42, %v3867_v36 }
 0x126   :  { %v3913_v46 = vadd.f32 %v2635_v43, %v1432_v45  ;;  %v2596_v47 = vpop.f32.mrb[24].mxu0 }
 0x127   :  { %v2636_v48 = vpop.f32.mrb[24].mxu1  ;;  %v2597_v49 = vpop.f32.mrb[25].mxu0 }
 0x128   :  { %v2598_v51 = vadd.f32 %v2597_v49, %v2596_v47  ;;  %v2637_v53 = vpop.f32.mrb[25].mxu1  ;;  %v2599_v54 = vpop.f32.mrb[26].mxu0 }
 0x129   :  { %v2638_v55 = vadd.f32 %v2637_v53, %v2636_v48  ;;  %v2639_v56 = vpop.f32.mrb[26].mxu1  ;;  %v2600_v57 = vpop.f32.mrb[27].mxu0 }
 0x12a   :  { %v1437_v58 = vadd.f32 %v2598_v51, %v3870_v50  ;;  %v2601_v59 = vadd.f32 %v2600_v57, %v2599_v54  ;;  %v2640_v33 = vpop.f32.mrb[27].mxu1 }
 0x12b   :  { %v2641_v60 = vadd.f32 %v2640_v33, %v2639_v56 }
 0x12c   :  { %v1502_v61 = vadd.f32 %v2638_v55, %v1437_v58  ;;  %v1440_v62 = vadd.f32 %v2601_v59, %v3873_v52 }
 0x12e   :  { %v3917_v36 = vadd.f32 %v2641_v60, %v1440_v62  ;;  %v2602_v63 = vpop.f32.mrb[28].mxu0 }
 0x12f   :  { %v2642_v1 = vpop.f32.mrb[28].mxu1  ;;  %v2603_v2 = vpop.f32.mrb[29].mxu0 }
 0x130   :  { %v2604_v4 = vadd.f32 %v2603_v2, %v2602_v63  ;;  %v2643_v5 = vpop.f32.mrb[29].mxu1  ;;  %v2605_v6 = vpop.f32.mrb[30].mxu0 }
 0x131   :  { %v2644_v8 = vadd.f32 %v2643_v5, %v2642_v1  ;;  %v2645_v0 = vpop.f32.mrb[30].mxu1  ;;  %v2606_v9 = vpop.f32.mrb[31].mxu0 }
 0x132   :  { %v1445_v10 = vadd.f32 %v2604_v4, %v3876_v3  ;;  %v2607_v50 = vadd.f32 %v2606_v9, %v2605_v6  ;;  %v2646_v11 = vpop.f32.mrb[31].mxu1 }
 0x133   :  { %v2647_v12 = vadd.f32 %v2646_v11, %v2645_v0 }
 0x134   :  { %v1510_v13 = vadd.f32 %v2644_v8, %v1445_v10  ;;  %v1448_v14 = vadd.f32 %v2607_v50, %v3885_v7 }
 0x136   :  { %v3921_v52 = vadd.f32 %v2647_v12, %v1448_v14  ;;  %v2664_v16 = vpop.f32.mrb[32].mxu0 }
 0x137   :  { %v2704_v18 = vpop.f32.mrb[32].mxu1  ;;  %v2665_v19 = vpop.f32.mrb[33].mxu0 }
 0x138   :  { %v2705_v20 = vpop.f32.mrb[33].mxu1  ;;  %v2666_v21 = vadd.f32 %v2665_v19, %v2664_v16  ;;  %v2667_v23 = vpop.f32.mrb[34].mxu0 }
 0x139   :  { %v2706_v22 = vadd.f32 %v2705_v20, %v2704_v18  ;;  %v2707_v24 = vpop.f32.mrb[34].mxu1  ;;  %v2668_v25 = vpop.f32.mrb[35].mxu0 }
 0x13a   :  { %v2708_v27 = vpop.f32.mrb[35].mxu1  ;;  %v1551_v3 = vadd.f32 %v2666_v21, %v3900_v26  ;;  %v2669_v28 = vadd.f32 %v2668_v25, %v2667_v23 }
 0x13b   :  { %v2709_v29 = vadd.f32 %v2708_v27, %v2707_v24 }
 0x13c   :  { %v1616_v15 = vadd.f32 %v2706_v22, %v1551_v3  ;;  %v1554_v31 = vadd.f32 %v2669_v28, %v3909_v30 }
 0x13e   :  { %v3925_v7 = vadd.f32 %v2709_v29, %v1554_v31  ;;  %v2670_v32 = vpop.f32.mrb[36].mxu0 }
 0x13f   :  { %v2710_v34 = vpop.f32.mrb[36].mxu1  ;;  %v2671_v35 = vpop.f32.mrb[37].mxu0 }
 0x140   :  { %v2672_v37 = vadd.f32 %v2671_v35, %v2670_v32  ;;  %v2711_v38 = vpop.f32.mrb[37].mxu1  ;;  %v2673_v17 = vpop.f32.mrb[38].mxu0 }
 0x141   :  { %v2712_v39 = vadd.f32 %v2711_v38, %v2710_v34  ;;  %v2713_v40 = vpop.f32.mrb[38].mxu1  ;;  %v2674_v41 = vpop.f32.mrb[39].mxu0 }
 0x142   :  { %v1559_v42 = vadd.f32 %v2672_v37, %v1494_v44  ;;  %v2675_v43 = vadd.f32 %v2674_v41, %v2673_v17  ;;  %v2714_v45 = vpop.f32.mrb[39].mxu1 }
 0x143   :  { %v2715_v26 = vadd.f32 %v2714_v45, %v2713_v40 }
 0x144   :  { %v3927_v47 = vadd.f32 %v2712_v39, %v1559_v42  ;;  %v1562_v48 = vadd.f32 %v2675_v43, %v3913_v46 }
 0x146   :  { %v3930_v30 = vadd.f32 %v2715_v26, %v1562_v48  ;;  %v2676_v49 = vpop.f32.mrb[40].mxu0 }
 0x147   :  { %v2716_v51 = vpop.f32.mrb[40].mxu1  ;;  %v2677_v53 = vpop.f32.mrb[41].mxu0 }
 0x148   :  { %v2678_v54 = vadd.f32 %v2677_v53, %v2676_v49  ;;  %v2717_v55 = vpop.f32.mrb[41].mxu1  ;;  %v2679_v56 = vpop.f32.mrb[42].mxu0 }
 0x149   :  { %v2718_v57 = vadd.f32 %v2717_v55, %v2716_v51  ;;  %v2719_v58 = vpop.f32.mrb[42].mxu1  ;;  %v2680_v59 = vpop.f32.mrb[43].mxu0 }
 0x14a   :  { %v1567_v33 = vadd.f32 %v2678_v54, %v1502_v61  ;;  %v2681_v44 = vadd.f32 %v2680_v59, %v2679_v56  ;;  %v2720_v60 = vpop.f32.mrb[43].mxu1 }
 0x14b   :  { %v2721_v62 = vadd.f32 %v2720_v60, %v2719_v58 }
 0x14c   :  { %v3932_v63 = vadd.f32 %v2718_v57, %v1567_v33  ;;  %v1570_v1 = vadd.f32 %v2681_v44, %v3917_v36 }
 0x14e   :  { %v3935_v46 = vadd.f32 %v2721_v62, %v1570_v1  ;;  %v2682_v2 = vpop.f32.mrb[44].mxu0 }
 0x14f   :  { %v2722_v4 = vpop.f32.mrb[44].mxu1  ;;  %v2683_v5 = vpop.f32.mrb[45].mxu0 }
 0x150   :  { %v2723_v6 = vpop.f32.mrb[45].mxu1  ;;  %v2684_v8 = vadd.f32 %v2683_v5, %v2682_v2  ;;  %v2685_v9 = vpop.f32.mrb[46].mxu0 }
 0x151   :  { %v2724_v0 = vadd.f32 %v2723_v6, %v2722_v4  ;;  %v2725_v10 = vpop.f32.mrb[46].mxu1  ;;  %v2686_v50 = vpop.f32.mrb[47].mxu0 }
 0x152   :  { %v2726_v11 = vpop.f32.mrb[47].mxu1  ;;  %v1575_v61 = vadd.f32 %v2684_v8, %v1510_v13  ;;  %v2687_v12 = vadd.f32 %v2686_v50, %v2685_v9 }
 0x153   :  { %v2727_v14 = vadd.f32 %v2726_v11, %v2725_v10 }
 0x154   :  { %v3937_v16 = vadd.f32 %v2724_v0, %v1575_v61  ;;  %v1578_v18 = vadd.f32 %v2687_v12, %v3921_v52 }
 0x156   :  { %v3940_v36 = vadd.f32 %v2727_v14, %v1578_v18  ;;  %v2744_v19 = vpop.f32.mrb[48].mxu0 }
 0x157   :  { %v2784_v20 = vpop.f32.mrb[48].mxu1  ;;  %v2745_v21 = vpop.f32.mrb[49].mxu0 }
 0x158   :  { %v2746_v22 = vadd.f32 %v2745_v21, %v2744_v19  ;;  %v2785_v23 = vpop.f32.mrb[49].mxu1  ;;  %v2747_v24 = vpop.f32.mrb[50].mxu0 }
 0x159   :  { %v2786_v25 = vadd.f32 %v2785_v23, %v2784_v20  ;;  %v2787_v27 = vpop.f32.mrb[50].mxu1  ;;  %v2748_v3 = vpop.f32.mrb[51].mxu0 }
 0x15a   :  { %v1681_v28 = vadd.f32 %v2746_v22, %v1616_v15  ;;  %v2749_v29 = vadd.f32 %v2748_v3, %v2747_v24  ;;  %v2788_v13 = vpop.f32.mrb[51].mxu1 }
 0x15b   :  { %v2789_v31 = vadd.f32 %v2788_v13, %v2787_v27 }
 0x15c   :  { %v1746_v32 = vadd.f32 %v2786_v25, %v1681_v28  ;;  %v1684_v34 = vadd.f32 %v2749_v29, %v3925_v7 }
 0x15e   :  { %v1749_v35 = vadd.f32 %v2789_v31, %v1684_v34  ;;  %v2750_v52 = vpop.f32.mrb[52].mxu0  ;;  %v1776_v17 = vmax.f32 %v1746_v32, 0.0  ;;  %v2984_v34 = vld [vmem:[%s4235_s6] sm:$0xff]  }
 0x15f   :  { %v2790_v37 = vpop.f32.mrb[52].mxu1  ;;  %v2751_v38 = vpop.f32.mrb[53].mxu0  ;;  %2838 = vmatprep.subr.bf16.mxu1 %v2984_v34 }
 0x160   :  { %v1777_v39 = vmax.f32 %v1749_v35, 0.0  ;;  %v2752_v40 = vadd.f32 %v2751_v38, %v2750_v52  ;;  %v2791_v41 = vpop.f32.mrb[53].mxu1  ;;  %v2753_v42 = vpop.f32.mrb[54].mxu0  ;;  %2839 = vmatpush3.bf16.msra.mxu1 %v2984_v34 }
 0x161   :  { %v2792_v43 = vadd.f32 %v2791_v41, %v2790_v37  ;;  %v2793_v45 = vpop.f32.mrb[54].mxu1  ;;  %v2754_v26 = vpop.f32.mrb[55].mxu0 }
 0x162   :  { %v1784_v15 = vpack.c.bf16 %v1777_v39, %v1776_v17  ;;  %v1689_v48 = vadd.f32 %v2752_v40, %v3927_v47  ;;  %v2755_v49 = vadd.f32 %v2754_v26, %v2753_v42  ;;  %v2794_v51 = vpop.f32.mrb[55].mxu1 }
 0x163   :  { %v2795_v53 = vadd.f32 %v2794_v51, %v2793_v45 }
 0x164   :  { %v1754_v7 = vadd.f32 %v2792_v43, %v1689_v48  ;;  %v1692_v54 = vadd.f32 %v2755_v49, %v3930_v30  ;;  %2830 = vmatprep.mubr.msk.bf16.mxu0 %vm1820_vm0, %v1784_v15 }
 0x166   :  { %v1757_v55 = vadd.f32 %v2795_v53, %v1692_v54  ;;  %v2756_v56 = vpop.f32.mrb[56].mxu0  ;;  %v1778_v59 = vmax.f32 %v1754_v7, 0.0 }
 0x167   :  { %v2796_v57 = vpop.f32.mrb[56].mxu1  ;;  %v2757_v58 = vpop.f32.mrb[57].mxu0 }
 0x168   :  { %v1779_v33 = vmax.f32 %v1757_v55, 0.0  ;;  %v2758_v44 = vadd.f32 %v2757_v58, %v2756_v56  ;;  %v2797_v60 = vpop.f32.mrb[57].mxu1  ;;  %v2759_v62 = vpop.f32.mrb[58].mxu0 }
 0x169   :  { %v2798_v1 = vadd.f32 %v2797_v60, %v2796_v57  ;;  %v2799_v2 = vpop.f32.mrb[58].mxu1  ;;  %v2760_v47 = vpop.f32.mrb[59].mxu0 }
 0x16a   :  { %v1785_v4 = vpack.c.bf16 %v1779_v33, %v1778_v59  ;;  %v1697_v5 = vadd.f32 %v2758_v44, %v3932_v63  ;;  %v2761_v6 = vadd.f32 %v2760_v47, %v2759_v62  ;;  %v2800_v8 = vpop.f32.mrb[59].mxu1 }
 0x16b   :  { %v2801_v30 = vadd.f32 %v2800_v8, %v2799_v2 }
 0x16c   :  { %v1762_v0 = vadd.f32 %v2798_v1, %v1697_v5  ;;  %v1700_v9 = vadd.f32 %v2761_v6, %v3935_v46  ;;  %2831 = vmatmul.mubr.msk.bf16.vlgmr.msra.gmra.mrb[64].mxu0 %vm1820_vm0, %v1785_v4 }
 0x16e   :  { %v1765_v10 = vadd.f32 %v2801_v30, %v1700_v9  ;;  %v2762_v50 = vpop.f32.mrb[60].mxu0  ;;  %v1780_v12 = vmax.f32 %v1762_v0, 0.0 }
 0x16f   :  { %v2802_v11 = vpop.f32.mrb[60].mxu1  ;;  %v2763_v61 = vpop.f32.mrb[61].mxu0 }
 0x170   :  { %v1781_v14 = vmax.f32 %v1765_v10, 0.0  ;;  %v2764_v18 = vadd.f32 %v2763_v61, %v2762_v50  ;;  %v2803_v19 = vpop.f32.mrb[61].mxu1  ;;  %v2765_v20 = vpop.f32.mrb[62].mxu0 }
 0x171   :  { %v2804_v21 = vadd.f32 %v2803_v19, %v2802_v11  ;;  %v2805_v22 = vpop.f32.mrb[62].mxu1  ;;  %v2766_v63 = vpop.f32.mrb[63].mxu0 }
 0x172   :  { %v1786_v23 = vpack.c.bf16 %v1781_v14, %v1780_v12  ;;  %v1705_v24 = vadd.f32 %v2764_v18, %v3937_v16  ;;  %v2767_v25 = vadd.f32 %v2766_v63, %v2765_v20  ;;  %v2806_v27 = vpop.f32.mrb[63].mxu1 }
 0x173   :  { %v2807_v46 = vadd.f32 %v2806_v27, %v2805_v22 }
 0x174   :  { %v1770_v3 = vadd.f32 %v2804_v21, %v1705_v24  ;;  %v1708_v28 = vadd.f32 %v2767_v25, %v3940_v36  ;;  %2834 = vmatprep.mubr.msk.bf16.mxu0 %vm1820_vm0, %v1786_v23 }
 0x176   :  { %v1773_v29 = vadd.f32 %v2807_v46, %v1708_v28  ;;  %v1782_v13 = vmax.f32 %v1770_v3, 0.0 }
 0x178   :  { %v1783_v31 = vmax.f32 %v1773_v29, 0.0 }
 0x17a   :  { %v1787_v32 = vpack.c.bf16 %v1783_v31, %v1782_v13 }
 0x17c   :  { %2835 = vmatmul.mubr.msk.bf16.gmra.mrb[68].mxu0 %vm1820_vm0, %v1787_v32 }
 0x23f   :  { %v3956_v16 = vpop.f32.mrb[64].mxu0 }
 0x240   :  { %v2021_v35 = vand.u32 2147483647, %v3956_v16  ;;  %v3959_v36 = vpop.f32.mrb[65].mxu0  ;;  %v1902_v48 = vsel %vm1898_vm1, %v3956_v16, 0.0  ;;  %v1997_v25 = vmax.f32 %v3956_v16, 0.0  ;;  %vm2005_vm2 = vcmp.ne.f32.partialorder %v3956_v16, %v3956_v16 }
 0x241   :  { %v2019_v52 = vand.u32 2147483647, %v3959_v36  ;;  %v3962_v37 = vpop.f32.mrb[66].mxu0  ;;  %v1899_v40 = vsel %vm1898_vm1, %v3959_v36, 0.0  ;;  %vm2003_vm7 = vcmp.ne.f32.partialorder %v3959_v36, %v3959_v36 }
 0x242   :  { %v2029_v38 = vsub.f32 0.0, %v2021_v35  ;;  %v2022_v17 = vand.u32 2147483647, %v3962_v37  ;;  %v3965_v39 = vpop.f32.mrb[67].mxu0  ;;  %v1904_v7 = vsel %vm1898_vm1, %v3962_v37, 0.0  ;;  %vm2006_vm9 = vcmp.ne.f32.partialorder %v3962_v37, %v3962_v37 }
 0x243   :  { %v2027_v41 = vsub.f32 0.0, %v2019_v52  ;;  %v1900_v42 = vsel %vm1898_vm1, %v3965_v39, 0.0  ;;  %v2020_v43 = vand.u32 2147483647, %v3965_v39  ;;  %v1995_v52 = vmax.f32 %v3959_v36, 0.0 }
 0x244   :  { %v2039_v45 = vmul.f32 1.442695, %v2029_v38  ;;  %v2030_v26 = vsub.f32 0.0, %v2022_v17  ;;  %v1901_v15 = vadd.f32 %v1900_v42, %v1899_v40  ;;  %v1998_v38 = vmax.f32 %v3962_v37, 0.0 }
 0x245   :  { %v2035_v49 = vmul.f32 1.442695, %v2027_v41  ;;  %v2028_v51 = vsub.f32 0.0, %v2020_v43  ;;  %v1996_v17 = vmax.f32 %v3965_v39, 0.0  ;;  %vm2004_vm8 = vcmp.ne.f32.partialorder %v3965_v39, %v3965_v39 }
 0x246   :  { %2986 = vpow2.f32 %v2039_v45  ;;  %v1903_v53 = vadd.f32 %v1902_v48, %v1901_v15  ;;  %v2041_v54 = vmul.f32 1.442695, %v2030_v26 }
 0x247   :  { %2988 = vpow2.f32 %v2035_v49  ;;  %v2037_v56 = vmul.f32 1.442695, %v2028_v51 }
 0x248   :  { %v1905_v55 = vadd.f32 %v1904_v7, %v1903_v53  ;;  %2990 = vpow2.f32 %v2041_v54 }
 0x249   :  { %2992 = vpow2.f32 %v2037_v56 }
 0x24f   :  { %v3976_v57 = vpop.f32.mrb[68].mxu0 }
 0x250   :  { %v2987_v58 = vpop.eup %2986  ;;  %v2025_v59 = vand.u32 2147483647, %v3976_v57  ;;  %v3979_v33 = vpop.f32.mrb[69].mxu0  ;;  %v1910_v11 = vsel %vm1898_vm1, %v3976_v57, 0.0  ;;  %v2001_v15 = vmax.f32 %v3976_v57, 0.0  ;;  %vm2009_vm15 = vcmp.ne.f32.partialorder %v3976_v57, %v3976_v57 }
 0x251   :  { %v1906_v44 = vsel %vm1898_vm1, %v3979_v33, 0.0  ;;  %v2023_v60 = vand.u32 2147483647, %v3979_v33  ;;  %v3984_v62 = vpop.f32.mrb[70].mxu0  ;;  %v2069_v1 = vadd.f32 1.0, %v2987_v58  ;;  %v3988_v5 = vpop.eup %2988  ;;  %v2072_v18 = vmul.f32 -0.5, %v2987_v58 }
 0x252   :  { %v2033_v2 = vsub.f32 0.0, %v2025_v59  ;;  %v3986_v47 = vpop.f32.mrb[71].mxu0  ;;  %v1907_v4 = vadd.f32 %v1906_v44, %v1905_v55  ;;  %v2026_v9 = vand.u32 2147483647, %v3984_v62  ;;  %v3994_v50 = vpop.eup %2990  ;;  %v2051_v19 = vadd.f32 1.0, %v3988_v5 }
 0x253   :  { %v2031_v6 = vsub.f32 0.0, %v2023_v60  ;;  %v1908_v8 = vsel %vm1898_vm1, %v3986_v47, 0.0  ;;  %v2024_v30 = vand.u32 2147483647, %v3986_v47  ;;  %2994 = vlog2.f32 %v2069_v1  ;;  %v2993_v20 = vpop.eup %2992 }
 0x254   :  { %v2047_v0 = vmul.f32 1.442695, %v2033_v2  ;;  %v1909_v10 = vadd.f32 %v1908_v8, %v1907_v4  ;;  %v1912_v21 = vsel %vm1898_vm1, %v3984_v62, 0.0  ;;  %v2034_v63 = vsub.f32 0.0, %v2026_v9 }
 0x255   :  { %v2043_v61 = vmul.f32 1.442695, %v2031_v6  ;;  %v2032_v12 = vsub.f32 0.0, %v2024_v30  ;;  %v2078_v24 = vadd.f32 1.0, %v3994_v50  ;;  %v2073_v46 = vadd.f32 1.0, %v2072_v18 }
 0x256   :  { %2996 = vpow2.f32 %v2047_v0  ;;  %v1911_v14 = vadd.f32 %v1910_v11, %v1909_v10  ;;  %v2060_v3 = vadd.f32 1.0, %v2993_v20  ;;  %v2075_v28 = vand.u32 2147483647, %v2987_v58 }
 0x257   :  { %2998 = vpow2.f32 %v2043_v61  ;;  %v2045_v22 = vmul.f32 1.442695, %v2032_v12  ;;  %v2054_v29 = vmul.f32 -0.5, %v3988_v5  ;;  %v2081_v13 = vmul.f32 -0.5, %v3994_v50 }
 0x258   :  { %v1913_v23 = vadd.f32 %v1912_v21, %v1911_v14  ;;  %v2049_v31 = vmul.f32 1.442695, %v2034_v63  ;;  %v2063_v34 = vmul.f32 -0.5, %v2993_v20  ;;  %v2074_v42 = vmul.f32 %v2987_v58, %v2073_v46 }
 0x259   :  { %3000 = vpow2.f32 %v2045_v22  ;;  %v2057_v43 = vand.u32 2147483647, %v3988_v5  ;;  %vm2076_vm3 = vcmp.lt.f32.partialorder %v2075_v28, 0.0004427343  ;;  %v2055_v45 = vadd.f32 1.0, %v2054_v29 }
 0x25a   :  { %v1914_v27 = vrot.slane %v1913_v23, 4  ;;  %3002 = vlog2.f32 %v2051_v19  ;;  %v2082_v26 = vadd.f32 1.0, %v2081_v13  ;;  %v2064_v53 = vadd.f32 1.0, %v2063_v34 }
 0x25b   :  { %3004 = vlog2.f32 %v2078_v24  ;;  %v2084_v55 = vand.u32 2147483647, %v3994_v50  ;;  %v2066_v56 = vand.u32 2147483647, %v2993_v20  ;;  %vm4016_vm4 = vcmp.lt.f32.partialorder %v2057_v43, 0.0004427343 }
 0x25c   :  { %v1915_v32 = vadd.f32 %v1914_v27, %v1913_v23  ;;  %3006 = vlog2.f32 %v2060_v3  ;;  %v4024_v6 = vmul.f32 %v3988_v5, %v2055_v45  ;;  %v4027_v8 = vmul.f32 %v3994_v50, %v2082_v26 }
 0x25d   :  { %v2995_v35 = vpop.eup %2994  ;;  %3008 = vpow2.f32 %v2049_v31  ;;  %v1999_v30 = vmax.f32 %v3979_v33, 0.0  ;;  %v4030_v10 = vmul.f32 %v2993_v20, %v2064_v53  ;;  %v2000_v11 = vmax.f32 %v3986_v47, 0.0 }
 0x25e   :  { %v1916_v40 = vrot.slane %v1915_v32, 2  ;;  %v2071_v41 = vmul.f32 0.6931472, %v2995_v35  ;;  %vm4039_vm5 = vcmp.lt.f32.partialorder %v2084_v55, 0.0004427343  ;;  %v2156_v35 = vpop.permute.xlu0 %2155  ;;  %vm2007_vm11 = vcmp.ne.f32.partialorder %v3979_v33, %v3979_v33 }
 0x25f   :  { %vm4043_vm6 = vcmp.lt.f32.partialorder %v2066_v56, 0.0004427343  ;;  %vm2008_vm13 = vcmp.ne.f32.partialorder %v3986_v47, %v3986_v47 }
 0x260   :  { %v4012_v48 = vpop.eup %2996  ;;  %v1917_v49 = vadd.f32 %v1916_v40, %v1915_v32  ;;  %v2077_v51 = vsel %vm2076_vm3, %v2074_v42, %v2071_v41  ;;  %v2985_v40 = vld [vmem:[%s4235_s6 + $0x8] sm:$0xff]   ;;  %s3021_s6 = smov 96   ;;  %vm2331_vm3 = vcmask 130048  }
 0x261   :  { %v2999_v7 = vpop.eup %2998  ;;  %v2125_v54 = vadd.f32 %v2077_v51, %v1997_v25  ;;  %v2105_v58 = vadd.f32 1.0, %v4012_v48  ;;  %v2108_v2 = vmul.f32 -0.5, %v4012_v48  ;;  %v2111_v19 = vand.u32 2147483647, %v4012_v48  ;;  %2840 = vmatprep.subr.bf16.mxu1 %v2985_v40 }
 0x262   :  { %v1918_v59 = vrot.slane %v1917_v49, 1  ;;  %v2087_v60 = vadd.f32 1.0, %v2999_v7  ;;  %v2090_v1 = vmul.f32 -0.5, %v2999_v7  ;;  %v2093_v14 = vand.u32 2147483647, %v2999_v7  ;;  %2841 = vmatpush3.bf16.msra.mxu1 %v2985_v40 }
 0x263   :  { %v4021_v4 = vpop.eup %3000  ;;  %3010 = vlog2.f32 %v2105_v58  ;;  %v4037_v5 = vsel %vm2005_vm2, %v3956_v16, %v2125_v54  ;;  %v4051_v23 = vadd.f32 1.0, %v2108_v2  ;;  %vm4093_vm12 = vcmp.lt.f32.partialorder %v2111_v19, 0.0004427343 }
 0x264   :  { %v3003_v0 = vpop.eup %3002  ;;  %v1919_v9 = vadd.f32 %v1918_v59, %v1917_v49  ;;  %3012 = vlog2.f32 %v2087_v60  ;;  %v2096_v18 = vadd.f32 1.0, %v4021_v4  ;;  %v2091_v63 = vadd.f32 1.0, %v2090_v1 }
 0x265   :  { %v3005_v61 = vpop.eup %3004  ;;  %v2053_v22 = vmul.f32 0.6931472, %v3003_v0  ;;  %v2099_v27 = vmul.f32 -0.5, %v4021_v4  ;;  %vm4084_vm10 = vcmp.lt.f32.partialorder %v2093_v14, 0.0004427343  ;;  %v2160_v0 = vpop.permute.xlu1 %2159  ;;  %vm2010_vm2 = vcmp.ne.f32.partialorder %v3984_v62, %v3984_v62 }
 0x266   :  { %v3007_v20 = vpop.eup %3006  ;;  %v4049_v21 = vmul.f32 0.015625, %v1919_v9  ;;  %v2080_v24 = vmul.f32 0.6931472, %v3005_v61  ;;  %3014 = vlog2.f32 %v2096_v18  ;;  %v2092_v51 = vmul.f32 %v2999_v7, %v2091_v63  ;;  %v2158_v63 = vpop.permute.xlu0 %2157 }
 0x267   :  { %v2062_v25 = vmul.f32 0.6931472, %v3007_v20  ;;  %v4079_v41 = vpop.eup %3008  ;;  %v2059_v49 = vsel %vm4016_vm4, %v4024_v6, %v2053_v22  ;;  %v2102_v54 = vand.u32 2147483647, %v4021_v4  ;;  %v2100_v59 = vadd.f32 1.0, %v2099_v27 }
 0x268   :  { %v1922_v46 = vsub.f32 %v3959_v36, %v4049_v21  ;;  %v1923_v3 = vsub.f32 %v3965_v39, %v4049_v21  ;;  %v1924_v28 = vsub.f32 %v3956_v16, %v4049_v21  ;;  %v1925_v29 = vsub.f32 %v3962_v37, %v4049_v21 }
 0x269   :  { %v1926_v13 = vsub.f32 %v3979_v33, %v4049_v21  ;;  %v1927_v31 = vsub.f32 %v3986_v47, %v4049_v21  ;;  %v1928_v32 = vsub.f32 %v3976_v57, %v4049_v21  ;;  %v1929_v34 = vsub.f32 %v3984_v62, %v4049_v21 }
 0x26a   :  { %v1930_v42 = vmul.f32 %v1922_v46, %v1922_v46  ;;  %v1931_v43 = vmul.f32 %v1923_v3, %v1923_v3  ;;  %v1932_v45 = vmul.f32 %v1924_v28, %v1924_v28  ;;  %v1933_v26 = vmul.f32 %v1925_v29, %v1925_v29 }
 0x26b   :  { %v1934_v55 = vmul.f32 %v1926_v13, %v1926_v13  ;;  %v1935_v60 = vmul.f32 %v1927_v31, %v1927_v31  ;;  %v1936_v1 = vmul.f32 %v1928_v32, %v1928_v32  ;;  %v2123_v14 = vadd.f32 %v2059_v49, %v1995_v52  ;;  %v2162_v31 = vpop.permute.xlu1 %2161 }
 0x26c   :  { %v1938_v56 = vsel %vm1898_vm1, %v1930_v42, 0.0  ;;  %v1939_v58 = vsel %vm1898_vm1, %v1931_v43, 0.0  ;;  %v1941_v6 = vsel %vm1898_vm1, %v1932_v45, 0.0  ;;  %v1943_v61 = vsel %vm1898_vm1, %v1933_v26, 0.0  ;;  %v2164_v26 = vpop.permute.xlu0 %2163 }
 0x26d   :  { %v3011_v7 = vpop.eup %3010  ;;  %v1940_v2 = vadd.f32 %v1939_v58, %v1938_v56  ;;  %v2086_v18 = vsel %vm4039_vm5, %v4027_v8, %v2080_v24  ;;  %v2068_v19 = vsel %vm4043_vm6, %v4030_v10, %v2062_v25  ;;  %v1945_v46 = vsel %vm1898_vm1, %v1934_v55, 0.0 }
 0x26e   :  { %v3013_v9 = vpop.eup %3012  ;;  %v2126_v22 = vadd.f32 %v2086_v18, %v1998_v38  ;;  %v2124_v27 = vadd.f32 %v2068_v19, %v1996_v17  ;;  %v2131_v8 = vsel %vm2003_vm7, %v3959_v36, %v2123_v14  ;;  %v2101_v10 = vmul.f32 %v4021_v4, %v2100_v59 }
 0x26f   :  { %v1942_v20 = vadd.f32 %v1941_v6, %v1940_v2  ;;  %v2089_v52 = vmul.f32 0.6931472, %v3013_v9  ;;  %vm4119_vm14 = vcmp.lt.f32.partialorder %v2102_v54, 0.0004427343  ;;  %v2179_v24 = vmul.f32 %v2156_v35, %v2131_v8  ;;  %v2166_v56 = vpop.permute.xlu1 %2165 }
 0x270   :  { %v3015_v12 = vpop.eup %3014  ;;  %v2132_v17 = vsel %vm2004_vm8, %v3965_v39, %v2124_v27  ;;  %v2107_v25 = vmul.f32 0.6931472, %v3011_v7  ;;  %v2134_v3 = vsel %vm2006_vm9, %v3962_v37, %v2126_v22  ;;  %v2110_v35 = vmul.f32 %v4012_v48, %v4051_v23  ;;  %v2168_v7 = vpop.permute.xlu0 %2167 }
 0x271   :  { %v1944_v38 = vadd.f32 %v1943_v61, %v1942_v20  ;;  %v2180_v28 = vmul.f32 %v2158_v63, %v2132_v17  ;;  %v2095_v4 = vsel %vm4084_vm10, %v2092_v51, %v2089_v52  ;;  %v2098_v29 = vmul.f32 0.6931472, %v3015_v12  ;;  %2195 = vrot.lane.b32.xlu0 %v2179_v24, %s3021_s6  ;;  %v1960_v17 = vld [vmem:[%s4236_s4] sm:$0x1] }
 0x272   :  { %v2127_v32 = vadd.f32 %v2095_v4, %v1999_v30  ;;  %v2114_v40 = vadd.f32 1.0, %v4079_v41  ;;  %v1937_v42 = vmul.f32 %v1929_v34, %v1929_v34  ;;  %v1947_v43 = vsel %vm1898_vm1, %v1935_v60, 0.0  ;;  %v1964_v4 = vld [vmem:[%s4237_s5] sm:$0x1] }
 0x273   :  { %v1946_v13 = vadd.f32 %v1945_v46, %v1944_v38  ;;  %v2181_v45 = vmul.f32 %v2160_v0, %v4037_v5  ;;  %2197 = vrot.lane.b32.xlu1 %v2180_v28, %s3021_s6  ;;  %v2104_v49 = vsel %vm4119_vm14, %v2101_v10, %v2098_v29  ;;  %v2113_v23 = vsel %vm4093_vm12, %v2110_v35, %v2107_v25  ;;  %v2170_v52 = vpop.permute.xlu1 %2169 }
 0x274   :  { %v2135_v30 = vsel %vm2007_vm11, %v3979_v33, %v2127_v32  ;;  %v2128_v48 = vadd.f32 %v2104_v49, %v2000_v11  ;;  %v1949_v5 = vsel %vm1898_vm1, %v1936_v1, 0.0  ;;  %v2182_v34 = vmul.f32 %v2162_v31, %v2134_v3 }
 0x275   :  { %v1948_v51 = vadd.f32 %v1947_v43, %v1946_v13  ;;  %v2129_v53 = vadd.f32 %v2113_v23, %v2001_v15  ;;  %3016 = vlog2.f32 %v2114_v40  ;;  %2199 = vrot.lane.b32.xlu0 %v2181_v45, %s3021_s6  ;;  %v2183_v55 = vmul.f32 %v2164_v26, %v2135_v30 }
 0x276   :  { %v2136_v11 = vsel %vm2008_vm13, %v3986_v47, %v2128_v48  ;;  %v1951_v58 = vsel %vm1898_vm1, %v1937_v42, 0.0  ;;  %v2117_v15 = vmul.f32 -0.5, %v4079_v41  ;;  %v2120_v9 = vand.u32 2147483647, %v4079_v41 }
 0x277   :  { %v1950_v54 = vadd.f32 %v1949_v5, %v1948_v51  ;;  %2201 = vrot.lane.b32.xlu1 %v2182_v34, %s3021_s6  ;;  %v2184_v59 = vmul.f32 %v2166_v56, %v2136_v11  ;;  %v2137_v60 = vsel %vm2009_vm15, %v3976_v57, %v2129_v53  ;;  %v2002_v22 = vmax.f32 %v3984_v62, 0.0 }
 0x278   :  { %v2185_v6 = vmul.f32 %v2168_v7, %v2137_v60  ;;  %v2118_v0 = vadd.f32 1.0, %v2117_v15  ;;  %vm2121_vm0 = vcmp.lt.f32.partialorder %v2120_v9, 0.0004427343 }
 0x279   :  { %v1952_v44 = vadd.f32 %v1951_v58, %v1950_v54  ;;  %2203 = vrot.lane.b32.xlu0 %v2183_v55, %s3021_s6 }
 0x27a   :  { %v2119_v20 = vmul.f32 %v4079_v41, %v2118_v0  ;;  %v1968_v41 = vlaneseq  ;;  %v2481_v0 = vld [vmem:[%s4238_s7] ss:$0 sm:$0xff] }
 0x27b   :  { %v1953_v1 = vrot.slane %v1952_v44, 4  ;;  %2205 = vrot.lane.b32.xlu1 %v2184_v59, %s3021_s6 }
 0x27c   :  { %v1969_v24 = vshrl.u32 %v1968_v41, 7 }
 0x27d   :  { %v1954_v2 = vadd.f32 %v1953_v1, %v1952_v44  ;;  %2207 = vrot.lane.b32.xlu0 %v2185_v6, %s3021_s6 }
 0x27e   :  { %v1970_v25 = vsub.s32 0, %v1969_v24 }
 0x27f   :  { %v1955_v61 = vrot.slane %v1954_v2, 2  ;;  %v3017_v14 = vpop.eup %3016 }
 0x280   :  { %v2116_v19 = vmul.f32 0.6931472, %v3017_v14 }
 0x281   :  { %v1956_v18 = vadd.f32 %v1955_v61, %v1954_v2 }
 0x282   :  { %v2122_v27 = vsel %vm2121_vm0, %v2119_v20, %v2116_v19 }
 0x283   :  { %v1957_v63 = vrot.slane %v1956_v18, 1  ;;  %v2130_v46 = vadd.f32 %v2122_v27, %v2002_v22 }
 0x285   :  { %v1958_v8 = vadd.f32 %v1957_v63, %v1956_v18  ;;  %v2138_v10 = vsel %vm2010_vm2, %v3984_v62, %v2130_v46 }
 0x286   :  { %v2186_v12 = vmul.f32 %v2170_v52, %v2138_v10 }
 0x287   :  { %v1959_v50 = vmul.f32 0.015625, %v1958_v8 }
 0x288   :  { %2209 = vrot.lane.b32.xlu1 %v2186_v12, %s3021_s6 }
 0x289   :  { %v1961_v38 = vadd.f32 1e-05, %v1959_v50 }
 0x28b   :  { %3018 = vrsqrt.f32 %v1961_v38 }
 0x295   :  { %v3019_v3 = vpop.eup %3018 }
 0x296   :  { %v1963_v28 = vmul.f32 %v3019_v3, %v1960_v17 }
 0x298   :  { %v1965_v29 = vmul.f32 %v1963_v28, %v4049_v21  ;;  %v1971_v13 = vrot.slane %v1963_v28, %v1970_v25 }
 0x29a   :  { %v1966_v31 = vsub.f32 %v1964_v4, %v1965_v29  ;;  %v1973_v32 = vmul.f32 %v1971_v13, %v3959_v36  ;;  %v1974_v35 = vmul.f32 %v1971_v13, %v3965_v39  ;;  %v1975_v40 = vmul.f32 %v3956_v16, %v1971_v13 }
 0x29b   :  { %v1976_v42 = vmul.f32 %v3962_v37, %v1971_v13  ;;  %v1977_v43 = vmul.f32 %v1971_v13, %v3979_v33  ;;  %v1978_v45 = vmul.f32 %v1971_v13, %v3986_v47  ;;  %v1979_v26 = vmul.f32 %v3976_v57, %v1971_v13 }
 0x29c   :  { %v1985_v49 = vrot.slane %v1966_v31, %v1970_v25  ;;  %v1980_v51 = vmul.f32 %v3984_v62, %v1971_v13 }
 0x29e   :  { %v1987_v21 = vadd.f32 %v1985_v49, %v1973_v32  ;;  %v1988_v30 = vadd.f32 %v1985_v49, %v1974_v35  ;;  %v1989_v48 = vadd.f32 %v1985_v49, %v1975_v40  ;;  %v1990_v23 = vadd.f32 %v1985_v49, %v1976_v42 }
 0x29f   :  { %v1991_v36 = vadd.f32 %v1985_v49, %v1977_v43  ;;  %v1992_v5 = vadd.f32 %v1985_v49, %v1978_v45  ;;  %v1993_v39 = vadd.f32 %v1985_v49, %v1979_v26  ;;  %v1994_v34 = vadd.f32 %v1985_v49, %v1980_v51 }
 0x2e3   :  { %v2196_v16 = vpop.permute.xlu0 %2195 }
 0x2e4   :  { %v2219_v37 = vadd.f32 %v2196_v16, %v1987_v21 }
 0x2e5   :  { %v2198_v53 = vpop.permute.xlu1 %2197 }
 0x2e6   :  { %v2220_v54 = vadd.f32 %v2198_v53, %v1988_v30 }
 0x2e7   :  { %v2200_v55 = vpop.permute.xlu0 %2199 }
 0x2e8   :  { %v2227_v33 = vpack.c.bf16 %v2220_v54, %v2219_v37  ;;  %v2221_v56 = vadd.f32 %v2200_v55, %v1989_v48 }
 0x2e9   :  { %v2202_v47 = vpop.permute.xlu1 %2201 }
 0x2ea   :  { %v2222_v57 = vadd.f32 %v2202_v47, %v1990_v23  ;;  %2842 = vmatprep.mubr.msk.bf16.mxu1 %vm1898_vm1, %v2227_v33 }
 0x2eb   :  { %v2204_v11 = vpop.permute.xlu0 %2203 }
 0x2ec   :  { %v2228_v62 = vpack.c.bf16 %v2222_v57, %v2221_v56  ;;  %v2223_v59 = vadd.f32 %v2204_v11, %v1991_v36 }
 0x2ed   :  { %v2206_v58 = vpop.permute.xlu1 %2205 }
 0x2ee   :  { %2843 = vmatmul.mubr.msk.bf16.vlgmr.msra.gmra.mrb[64].mxu1 %vm1898_vm1, %v2228_v62  ;;  %v2224_v44 = vadd.f32 %v2206_v58, %v1992_v5 }
 0x2ef   :  { %v2208_v7 = vpop.permute.xlu0 %2207 }
 0x2f0   :  { %v2229_v15 = vpack.c.bf16 %v2224_v44, %v2223_v59  ;;  %v2225_v1 = vadd.f32 %v2208_v7, %v1993_v39 }
 0x2f2   :  { %2846 = vmatprep.mubr.msk.bf16.mxu1 %vm1898_vm1, %v2229_v15 }
 0x2fa   :  { %v2210_v60 = vpop.permute.xlu1 %2209 }
 0x2fb   :  { %v2226_v2 = vadd.f32 %v2210_v60, %v1994_v34 }
 0x2fd   :  { %v2230_v6 = vpack.c.bf16 %v2226_v2, %v2225_v1 }
 0x2ff   :  { %2847 = vmatmul.mubr.msk.bf16.gmra.mrb[68].mxu1 %vm1898_vm1, %v2230_v6 }
 0x3c1   :  { %v2844_v9 = vpop.f32.mrb[64].mxu1 }
 0x3c2   :  { %v2309_v61 = vadd.f32 %v2844_v9, %v2481_v0  ;;  %v2300_v14 = vpop.f32.mrb[65].mxu1 }
 0x3c3   :  { %v2301_v18 = vadd.f32 %v2481_v0, %v2300_v14  ;;  %v2845_v19 = vpop.f32.mrb[66].mxu1 }
 0x3c4   :  { %2334 = vst.msk [vmem:[%s4239_s9 + $0x10] sm:$0xff] %vm2331_vm3, %v2309_v61  ;;  %v2312_v20 = vadd.f32 %v2845_v19, %v2481_v0  ;;  %v2303_v22 = vpop.f32.mrb[67].mxu1 }
 0x3c5   :  { %2332 = vst.msk [vmem:[%s4239_s9] sm:$0xff] %vm2331_vm3, %v2301_v18  ;;  %v2304_v63 = vadd.f32 %v2481_v0, %v2303_v22 }
 0x3c6   :  { %2335 = vst.msk [vmem:[%s4239_s9 + $0x18] sm:$0xff] %vm2331_vm3, %v2312_v20 }
 0x3c7   :  { %2333 = vst.msk [vmem:[%s4239_s9 + $0x8] sm:$0xff] %vm2331_vm3, %v2304_v63 }
 0x3d2   :  { %v2848_v27 = vpop.f32.mrb[68].mxu1 }
 0x3d3   :  { %v2325_v52 = vadd.f32 %v2848_v27, %v2481_v0  ;;  %v2316_v46 = vpop.f32.mrb[69].mxu1 }
 0x3d4   :  { %v2317_v8 = vadd.f32 %v2481_v0, %v2316_v46  ;;  %v2849_v10 = vpop.f32.mrb[70].mxu1 }
 0x3d5   :  { %2338 = vst.msk [vmem:[%s4239_s9 + $0x30] sm:$0xff] %vm2331_vm3, %v2325_v52  ;;  %v2328_v50 = vadd.f32 %v2849_v10, %v2481_v0  ;;  %v2319_v12 = vpop.f32.mrb[71].mxu1 }
 0x3d6   :  { %2336 = vst.msk [vmem:[%s4239_s9 + $0x20] sm:$0xff] %vm2331_vm3, %v2317_v8  ;;  %v2320_v38 = vadd.f32 %v2481_v0, %v2319_v12 }
 0x3d7   :  { %2339 = vst.msk [vmem:[%s4239_s9 + $0x38] sm:$0xff] %vm2331_vm3, %v2328_v50 }
 0x3d8   :  { %2337 = vst.msk [vmem:[%s4239_s9 + $0x28] sm:$0xff] %vm2331_vm3, %v2320_v38 }

</bundles_post_ra>
